<compile_context>
chip_gen: v7x
topology: tpu7x:2x2x1
jax: 0.10.0
libtpu: 0.0.40
codegen_flags: <defaults>
</compile_context>

<pallas_src>
import functools

import numpy as np
import jax
import jax.numpy as jnp
from jax.experimental import pallas as pl
from jax.experimental.pallas import tpu as pltpu


# ------------------------------ fused kernel ------------------------------- #

def _fused_encoder_kernel(
    inv_temp_ref,                      # SMEM (1,) f32 : 1 / temperature
    x_ref,                             # VMEM (N, Cin*H*W) f32, raw NCHW flattening
    u_ref,                             # VMEM (N, latent) f32 uniform noise for Gumbel
    m1_ref, b1_ref,                    # folded conv1 : (Cin*H*W, P1*C1) bf16 / (1, P1*C1) f32
    m2_ref, b2_ref,                    # folded conv2
    m3_ref, b3_ref,                    # folded conv3 (spatial collapses to 1x1)
    m4_ref, b4_ref,                    # 1x1 conv4 as (3*s, 2*s) f32
    m5_ref, b5_ref,                    # 1x1 conv5 as (2*s, s) f32
    lw_ref, lb_ref,                    # linear1 as (s, latent) f32
    z_ref,                             # VMEM (N, latent) hard one-hot output
    logits_ref):                       # VMEM (N, latent) pre-Gumbel logits (exposed for tests)
    f32 = jnp.float32
    bf16 = jnp.bfloat16

    def dense(a, m_ref, b_ref, relu, low_precision):
        # One MXU matmul for the whole batch; f32 accumulation.
        lhs = a.astype(bf16) if low_precision else a
        out = jnp.dot(lhs, m_ref[...], preferred_element_type=f32) + b_ref[...]
        return jnp.maximum(out, 0.0) if relu else out

    h = dense(x_ref[...], m1_ref, b1_ref, relu=True, low_precision=True)    # conv1
    h = dense(h, m2_ref, b2_ref, relu=True, low_precision=True)             # conv2
    h = dense(h, m3_ref, b3_ref, relu=True, low_precision=True)             # conv3 -> (N, 3*s)
    h = dense(h, m4_ref, b4_ref, relu=True, low_precision=False)            # conv4 (1x1)
    h = dense(h, m5_ref, b5_ref, relu=False, low_precision=False)           # conv5 (1x1)
    logits = dense(h, lw_ref, lb_ref, relu=False, low_precision=False)      # linear1
    logits_ref[...] = logits

    # Hard straight-through Gumbel-softmax (forward value).
    eps = 1e-20
    inv_temp = inv_temp_ref[0]
    g = -jnp.log(-jnp.log(u_ref[...] + eps) + eps)
    y = (logits + g) * inv_temp
    m = jnp.max(y, axis=-1, keepdims=True)
    e = jnp.exp(y - m)
    s = e * pl.reciprocal(jnp.sum(e, axis=-1, keepdims=True), approx=True)   # EUP
    lanes = jax.lax.broadcasted_iota(jnp.int32, y.shape, 1)
    # argmax(y) == argmax(softmax(y)); first-index tie-break.
    idx = jnp.min(jnp.where(y >= m, lanes, y.shape[-1]), axis=-1, keepdims=True)
    one_hot = (lanes == idx).astype(f32)
    # (y_hard - y).detach() + y  -> numerically (one_hot - s) + s
    z_ref[...] = (one_hot - s) + s


# --------------------------- host-side preparation -------------------------- #

def fold_conv_layer(w, b, hin, win, stride, pad, in_layout):
    """Fold a Conv2d (im2col tap selection + per-tap weights) into one dense matrix M
    and a per-output-feature bias row, so that  out_flat = act_flat @ M + bias_row.

    Input rows are indexed either with the raw NCHW flattening (layer 1, fed directly
    by x.reshape(N, C*H*W)) or channels-last ((h*W + w)*C + c, matching the previous
    layer's output column ordering).  Output columns are channels-last:
    (ho*Wout + wo)*O + o."""
    w = np.asarray(w, np.float32)
    b = np.asarray(b, np.float32)
    o_ch, c_ch, kh, kw = w.shape
    hout = (hin + 2 * pad - kh) // stride + 1
    wout = (win + 2 * pad - kw) // stride + 1
    m = np.zeros((hin * win * c_ch, hout * wout * o_ch), np.float32)
    for ho in range(hout):
        for wo in range(wout):
            col0 = (ho * wout + wo) * o_ch
            for ki in range(kh):
                hi = stride * ho + ki - pad
                if hi < 0 or hi >= hin:
                    continue
                for kj in range(kw):
                    wi = stride * wo + kj - pad
                    if wi < 0 or wi >= win:
                        continue
                    for c in range(c_ch):
                        if in_layout == "nchw":
                            row = c * hin * win + hi * win + wi
                        else:  # channels-last
                            row = (hi * win + wi) * c_ch + c
                        m[row, col0:col0 + o_ch] = w[:, c, ki, kj]
    bias_row = np.tile(b[None, :], (hout * wout, 1)).reshape(1, hout * wout * o_ch)
    return m, bias_row, hout, wout


def prepare_inputs(params, n_cin, n_hw):
    """One-time: fold every spatial conv into a single matrix (bf16 for the big ones),
    reshape the 1x1 convs / Linear to plain (Cin, Cout) f32 matrices, biases to (1, O)."""
    m1, bb1, h1, w1 = fold_conv_layer(params["w1"], params["b1"], n_hw, n_hw, 2, 1, "nchw")
    m2, bb2, h2, w2 = fold_conv_layer(params["w2"], params["b2"], h1, w1, 2, 1, "nhwc")
    m3, bb3, h3, w3 = fold_conv_layer(params["w3"], params["b3"], h2, w2, 1, 0, "nhwc")
    assert h3 == 1 and w3 == 1, "conv3 must collapse the spatial dims"

    prep = {
        "m1": jnp.asarray(m1, jnp.bfloat16), "b1": jnp.asarray(bb1),
        "m2": jnp.asarray(m2, jnp.bfloat16), "b2": jnp.asarray(bb2),
        "m3": jnp.asarray(m3, jnp.bfloat16), "b3": jnp.asarray(bb3),
        "m4": jnp.transpose(params["w4"][:, :, 0, 0], (1, 0)),
        "b4": params["b4"].reshape(1, -1),
        "m5": jnp.transpose(params["w5"][:, :, 0, 0], (1, 0)),
        "b5": params["b5"].reshape(1, -1),
        "lw": jnp.transpose(params["lw"], (1, 0)),
        "lb": params["lb"].reshape(1, -1),
    }
    return prep


# ------------------------------ jitted forward ------------------------------ #

@jax.jit
def _forward_impl(prep, x, u, temp):
    n = x.shape[0]
    latent = u.shape[1]
    x2d = x.reshape(n, -1)                      # raw NCHW flattening (layout folded into m1)
    inv_temp = jnp.reshape(1.0 / temp, (1,)).astype(jnp.float32)

    vmem = pl.BlockSpec(memory_space=pltpu.MemorySpace.VMEM)
    smem = pl.BlockSpec(memory_space=pltpu.MemorySpace.SMEM)
    args = (inv_temp, x2d, u,
            prep["m1"], prep["b1"], prep["m2"], prep["b2"], prep["m3"], prep["b3"],
            prep["m4"], prep["b4"], prep["m5"], prep["b5"], prep["lw"], prep["lb"])
    return pl.pallas_call(
        _fused_encoder_kernel,
        out_shape=(jax.ShapeDtypeStruct((n, latent), jnp.float32),   # hard one-hot z
                   jax.ShapeDtypeStruct((n, latent), jnp.float32)),  # logits (for tests)
        in_specs=[smem] + [vmem] * (len(args) - 1),
        out_specs=(vmem, vmem),
    )(*args)


def conv_encoder3_forward(prep, x, u, temp):
    return _forward_impl(prep, x, u, jnp.asarray(temp, jnp.float32))


# ------------------------------- parameters --------------------------------- #

def init_params(key, s_dim, n_cin, n_hw, latent_size):
    ks = jax.random.split(key, 12)

    def conv_p(kw, kb, o, c, ksize):
        fan_in = c * ksize * ksize
        bound = 1.0 / np.sqrt(fan_in)
        w = jax.random.uniform(kw, (o, c, ksize, ksize), jnp.float32, -bound, bound)
        b = jax.random.uniform(kb, (o,), jnp.float32, -bound, bound)
        return w, b

    w1, b1 = conv_p(ks[0], ks[1], s_dim, n_cin, 4)
    w2, b2 = conv_p(ks[2], ks[3], s_dim * 2, s_dim, 4)
    w3, b3 = conv_p(ks[4], ks[5], s_dim * 3, s_dim * 2, n_hw // 4)
    w4, b4 = conv_p(ks[6], ks[7], s_dim * 2, s_dim * 3, 1)
    w5, b5 = conv_p(ks[8], ks[9], s_dim, s_dim * 2, 1)
    lbound = 1.0 / np.sqrt(s_dim)
    lw = jax.random.uniform(ks[10], (latent_size, s_dim), jnp.float32, -lbound, lbound)
    lb = jax.random.uniform(ks[11], (latent_size,), jnp.float32, -lbound, lbound)
    return dict(w1=w1, b1=b1, w2=w2, b2=b2, w3=w3, b3=b3,
                w4=w4, b4=b4, w5=w5, b5=b5, lw=lw, lb=lb)


# --------------------------- pure-JAX reference ------------------------------ #

@jax.jit
def reference_forward(params, x, u, temp):
    def conv(h, w, b, stride, pad):
        out = jax.lax.conv_general_dilated(
            h, w, window_strides=(stride, stride),
            padding=((pad, pad), (pad, pad)),
            dimension_numbers=("NCHW", "OIHW", "NCHW"),
            precision=jax.lax.Precision.HIGHEST)
        return out + b.reshape(1, -1, 1, 1)

    h = jax.nn.relu(conv(x, params["w1"], params["b1"], 2, 1))
    h = jax.nn.relu(conv(h, params["w2"], params["b2"], 2, 1))
    h = jax.nn.relu(conv(h, params["w3"], params["b3"], 1, 0))
    h = jax.nn.relu(conv(h, params["w4"], params["b4"], 1, 0))
    h = conv(h, params["w5"], params["b5"], 1, 0)
    h = h.reshape(h.shape[0], -1)
    logits = jnp.dot(h, params["lw"].T, precision=jax.lax.Precision.HIGHEST) + params["lb"]
    g = -jnp.log(-jnp.log(u + 1e-20) + 1e-20)
    y = (logits + g) / temp
    s = jax.nn.softmax(y, axis=-1)
    one_hot = jax.nn.one_hot(jnp.argmax(s, axis=-1), s.shape[-1], dtype=s.dtype)
    return (one_hot - s) + s, logits, y


# ----------------------------------- main ------------------------------------ #

if __name__ == "__main__":
    s_dim, n_cin, n_hw, latent_size = 8, 4, 16, 16
    batch = 2
    iteration = 1

    key = jax.random.PRNGKey(0)
    kp, kx, ku = jax.random.split(key, 3)
    params = init_params(kp, s_dim, n_cin, n_hw, latent_size)
    x = jax.random.normal(kx, (batch, n_cin, n_hw, n_hw), jnp.float32)
    # TODO(synk): the module draws fresh torch.rand noise per call; here u is an explicit
    # input (deterministic for the test) — resample per step (or move to pltpu.prng_seed/
    # prng_random_bits in-kernel) when training.
    u = jax.random.uniform(ku, (batch, latent_size), jnp.float32)

    # Host-side temperature annealing (same rule as the PyTorch module).
    temp_ini, anneal_rate, temp_min = 1.0, 3e-05, 0.05
    temp = temp_ini
    if iteration % 100 == 1:
        temp = float(np.maximum(temp_ini * np.exp(-anneal_rate * iteration), temp_min))

    prep = prepare_inputs(params, n_cin, n_hw)

    z, logits_k = conv_encoder3_forward(prep, x, u, temp)
    z = jax.block_until_ready(z)

    assert z.shape == (batch, latent_size) and z.dtype == jnp.float32
    z_np = np.asarray(z)
    logits_k = np.asarray(logits_k)
    # each row's forward value is (numerically) a one-hot vector
    assert np.allclose(z_np.sum(axis=-1), 1.0, atol=1e-5)

    z_ref, logits_ref, y_ref = (np.asarray(a) for a in
                                jax.block_until_ready(reference_forward(params, x, u, temp)))
    # logits agree with the HIGHEST-precision f32 reference within bf16-MXU tolerance
    assert np.allclose(logits_k, logits_ref, atol=5e-2), \
        float(np.abs(logits_k - logits_ref).max())
    # hard one-hot matches the reference; per the review, an argmax flip is only accepted
    # when the reference's top-2 noisy logits are a genuine near-tie (bf16-induced).
    for r in range(batch):
        if int(z_np[r].argmax()) == int(z_ref[r].argmax()):
            assert np.allclose(z_np[r], z_ref[r], atol=1e-4)
        else:
            top2 = np.sort(y_ref[r])[-2:]
            assert float(top2[1] - top2[0]) < 5e-2, "one-hot mismatch not explained by a near-tie"

    print("KERNEL_OK")
</pallas_src>

<mosaic_0001>
module attributes {stable_mosaic.version = 11 : i64} {
  func.func @_fused_encoder_kernel(%arg0: memref<1xf32, #tpu.memory_space<smem>>, %arg1: memref<2x1024xf32, #tpu.memory_space<vmem>>, %arg2: memref<2x16xf32, #tpu.memory_space<vmem>>, %arg3: memref<1024x512xbf16, #tpu.memory_space<vmem>>, %arg4: memref<1x512xf32, #tpu.memory_space<vmem>>, %arg5: memref<512x256xbf16, #tpu.memory_space<vmem>>, %arg6: memref<1x256xf32, #tpu.memory_space<vmem>>, %arg7: memref<256x24xbf16, #tpu.memory_space<vmem>>, %arg8: memref<1x24xf32, #tpu.memory_space<vmem>>, %arg9: memref<24x16xf32, #tpu.memory_space<vmem>>, %arg10: memref<1x16xf32, #tpu.memory_space<vmem>>, %arg11: memref<16x8xf32, #tpu.memory_space<vmem>>, %arg12: memref<1x8xf32, #tpu.memory_space<vmem>>, %arg13: memref<8x16xf32, #tpu.memory_space<vmem>>, %arg14: memref<1x16xf32, #tpu.memory_space<vmem>>, %arg15: memref<2x16xf32, #tpu.memory_space<vmem>>, %arg16: memref<2x16xf32, #tpu.memory_space<vmem>>) attributes {dimension_semantics = [], scalar_prefetch = 0 : i64, scratch_operands = 0 : i64, tpu.core_type = #tpu.core_type<tc>} {
    %c0 = arith.constant 0 : index
    %c0_0 = arith.constant 0 : index
    %0 = vector.load %arg1[%c0, %c0_0] : memref<2x1024xf32, #tpu.memory_space<vmem>>, vector<2x1024xf32>
    %1 = arith.truncf %0 : vector<2x1024xf32> to vector<2x1024xbf16>
    %c0_1 = arith.constant 0 : index
    %c0_2 = arith.constant 0 : index
    %2 = vector.load %arg3[%c0_1, %c0_2] : memref<1024x512xbf16, #tpu.memory_space<vmem>>, vector<1024x512xbf16>
    %cst = arith.constant dense<0.000000e+00> : vector<2x512xf32>
    %3 = tpu.matmul %1, %2, %cst {dimension_numbers = #tpu.dot_dimension_numbers<[1], [0], [0], [1], [0, 0, 1, 1], [], []>} : vector<2x1024xbf16>, vector<1024x512xbf16>, vector<2x512xf32> -> vector<2x512xf32>
    %c0_3 = arith.constant 0 : index
    %c0_4 = arith.constant 0 : index
    %4 = vector.load %arg4[%c0_3, %c0_4] : memref<1x512xf32, #tpu.memory_space<vmem>>, vector<1x512xf32>
    %5 = vector.broadcast %4 : vector<1x512xf32> to vector<2x512xf32>
    %6 = arith.addf %3, %5 : vector<2x512xf32>
    %cst_5 = arith.constant 0.000000e+00 : f32
    %7 = vector.broadcast %cst_5 : f32 to vector<2x512xf32>
    %8 = arith.maximumf %6, %7 : vector<2x512xf32>
    %9 = arith.truncf %8 : vector<2x512xf32> to vector<2x512xbf16>
    %c0_6 = arith.constant 0 : index
    %c0_7 = arith.constant 0 : index
    %10 = vector.load %arg5[%c0_6, %c0_7] : memref<512x256xbf16, #tpu.memory_space<vmem>>, vector<512x256xbf16>
    %cst_8 = arith.constant dense<0.000000e+00> : vector<2x256xf32>
    %11 = tpu.matmul %9, %10, %cst_8 {dimension_numbers = #tpu.dot_dimension_numbers<[1], [0], [0], [1], [0, 0, 1, 1], [], []>} : vector<2x512xbf16>, vector<512x256xbf16>, vector<2x256xf32> -> vector<2x256xf32>
    %c0_9 = arith.constant 0 : index
    %c0_10 = arith.constant 0 : index
    %12 = vector.load %arg6[%c0_9, %c0_10] : memref<1x256xf32, #tpu.memory_space<vmem>>, vector<1x256xf32>
    %13 = vector.broadcast %12 : vector<1x256xf32> to vector<2x256xf32>
    %14 = arith.addf %11, %13 : vector<2x256xf32>
    %cst_11 = arith.constant 0.000000e+00 : f32
    %15 = vector.broadcast %cst_11 : f32 to vector<2x256xf32>
    %16 = arith.maximumf %14, %15 : vector<2x256xf32>
    %17 = arith.truncf %16 : vector<2x256xf32> to vector<2x256xbf16>
    %c0_12 = arith.constant 0 : index
    %c0_13 = arith.constant 0 : index
    %18 = vector.load %arg7[%c0_12, %c0_13] : memref<256x24xbf16, #tpu.memory_space<vmem>>, vector<256x24xbf16>
    %cst_14 = arith.constant dense<0.000000e+00> : vector<2x24xf32>
    %19 = tpu.matmul %17, %18, %cst_14 {dimension_numbers = #tpu.dot_dimension_numbers<[1], [0], [0], [1], [0, 0, 1, 1], [], []>} : vector<2x256xbf16>, vector<256x24xbf16>, vector<2x24xf32> -> vector<2x24xf32>
    %c0_15 = arith.constant 0 : index
    %c0_16 = arith.constant 0 : index
    %20 = vector.load %arg8[%c0_15, %c0_16] : memref<1x24xf32, #tpu.memory_space<vmem>>, vector<1x24xf32>
    %21 = vector.broadcast %20 : vector<1x24xf32> to vector<2x24xf32>
    %22 = arith.addf %19, %21 : vector<2x24xf32>
    %cst_17 = arith.constant 0.000000e+00 : f32
    %23 = vector.broadcast %cst_17 : f32 to vector<2x24xf32>
    %24 = arith.maximumf %22, %23 : vector<2x24xf32>
    %c0_18 = arith.constant 0 : index
    %c0_19 = arith.constant 0 : index
    %25 = vector.load %arg9[%c0_18, %c0_19] : memref<24x16xf32, #tpu.memory_space<vmem>>, vector<24x16xf32>
    %cst_20 = arith.constant dense<0.000000e+00> : vector<2x16xf32>
    %26 = tpu.matmul %24, %25, %cst_20 {dimension_numbers = #tpu.dot_dimension_numbers<[1], [0], [0], [1], [0, 0, 1, 1], [], []>} : vector<2x24xf32>, vector<24x16xf32>, vector<2x16xf32> -> vector<2x16xf32>
    %c0_21 = arith.constant 0 : index
    %c0_22 = arith.constant 0 : index
    %27 = vector.load %arg10[%c0_21, %c0_22] : memref<1x16xf32, #tpu.memory_space<vmem>>, vector<1x16xf32>
    %28 = vector.broadcast %27 : vector<1x16xf32> to vector<2x16xf32>
    %29 = arith.addf %26, %28 : vector<2x16xf32>
    %cst_23 = arith.constant 0.000000e+00 : f32
    %30 = vector.broadcast %cst_23 : f32 to vector<2x16xf32>
    %31 = arith.maximumf %29, %30 : vector<2x16xf32>
    %c0_24 = arith.constant 0 : index
    %c0_25 = arith.constant 0 : index
    %32 = vector.load %arg11[%c0_24, %c0_25] : memref<16x8xf32, #tpu.memory_space<vmem>>, vector<16x8xf32>
    %cst_26 = arith.constant dense<0.000000e+00> : vector<2x8xf32>
    %33 = tpu.matmul %31, %32, %cst_26 {dimension_numbers = #tpu.dot_dimension_numbers<[1], [0], [0], [1], [0, 0, 1, 1], [], []>} : vector<2x16xf32>, vector<16x8xf32>, vector<2x8xf32> -> vector<2x8xf32>
    %c0_27 = arith.constant 0 : index
    %c0_28 = arith.constant 0 : index
    %34 = vector.load %arg12[%c0_27, %c0_28] : memref<1x8xf32, #tpu.memory_space<vmem>>, vector<1x8xf32>
    %35 = vector.broadcast %34 : vector<1x8xf32> to vector<2x8xf32>
    %36 = arith.addf %33, %35 : vector<2x8xf32>
    %c0_29 = arith.constant 0 : index
    %c0_30 = arith.constant 0 : index
    %37 = vector.load %arg13[%c0_29, %c0_30] : memref<8x16xf32, #tpu.memory_space<vmem>>, vector<8x16xf32>
    %cst_31 = arith.constant dense<0.000000e+00> : vector<2x16xf32>
    %38 = tpu.matmul %36, %37, %cst_31 {dimension_numbers = #tpu.dot_dimension_numbers<[1], [0], [0], [1], [0, 0, 1, 1], [], []>} : vector<2x8xf32>, vector<8x16xf32>, vector<2x16xf32> -> vector<2x16xf32>
    %c0_32 = arith.constant 0 : index
    %c0_33 = arith.constant 0 : index
    %39 = vector.load %arg14[%c0_32, %c0_33] : memref<1x16xf32, #tpu.memory_space<vmem>>, vector<1x16xf32>
    %40 = vector.broadcast %39 : vector<1x16xf32> to vector<2x16xf32>
    %41 = arith.addf %38, %40 : vector<2x16xf32>
    %c0_34 = arith.constant 0 : index
    %c0_35 = arith.constant 0 : index
    %42 = vector.load %arg16[%c0_34, %c0_35] : memref<2x16xf32, #tpu.memory_space<vmem>>, vector<2x16xf32>
    tpu.vector_store %arg16[%c0_34, %c0_35], %41 {strides = array<i32>} : memref<2x16xf32, #tpu.memory_space<vmem>>, vector<2x16xf32>,
    %c0_36 = arith.constant 0 : index
    %43 = memref.load %arg0[%c0_36] : memref<1xf32, #tpu.memory_space<smem>>
    %c0_37 = arith.constant 0 : index
    %c0_38 = arith.constant 0 : index
    %44 = vector.load %arg2[%c0_37, %c0_38] : memref<2x16xf32, #tpu.memory_space<vmem>>, vector<2x16xf32>
    %cst_39 = arith.constant 9.99999968E-21 : f32
    %45 = vector.broadcast %cst_39 : f32 to vector<2x16xf32>
    %46 = arith.addf %44, %45 : vector<2x16xf32>
    %47 = math.log %46 : vector<2x16xf32>
    %cst_40 = arith.constant 0.000000e+00 : f32
    %48 = vector.broadcast %cst_40 : f32 to vector<2x16xf32>
    %49 = arith.subf %48, %47 : vector<2x16xf32>
    %cst_41 = arith.constant 9.99999968E-21 : f32
    %50 = vector.broadcast %cst_41 : f32 to vector<2x16xf32>
    %51 = arith.addf %49, %50 : vector<2x16xf32>
    %52 = math.log %51 : vector<2x16xf32>
    %cst_42 = arith.constant 0.000000e+00 : f32
    %53 = vector.broadcast %cst_42 : f32 to vector<2x16xf32>
    %54 = arith.subf %53, %52 : vector<2x16xf32>
    %55 = arith.addf %41, %54 : vector<2x16xf32>
    %56 = vector.broadcast %43 : f32 to vector<2x16xf32>
    %57 = arith.mulf %55, %56 : vector<2x16xf32>
    %cst_43 = arith.constant dense<0xFF800000> : vector<2xf32>
    %58 = vector.multi_reduction <maximumf>, %57, %cst_43 [1] : vector<2x16xf32> to vector<2xf32>
    %59 = vector.shape_cast %58 : vector<2xf32> to vector<2x1xf32>
    %60 = vector.broadcast %59 : vector<2x1xf32> to vector<2x16xf32>
    %61 = arith.subf %57, %60 : vector<2x16xf32>
    %62 = math.exp %61 : vector<2x16xf32>
    %cst_44 = arith.constant dense<0.000000e+00> : vector<2xf32>
    %63 = vector.multi_reduction <add>, %62, %cst_44 [1] : vector<2x16xf32> to vector<2xf32>
    %64 = vector.shape_cast %63 : vector<2xf32> to vector<2x1xf32>
    %65 = tpu.reciprocal %64 {approx = true} : vector<2x1xf32> -> vector<2x1xf32>
    %66 = vector.broadcast %65 : vector<2x1xf32> to vector<2x16xf32>
    %67 = arith.mulf %62, %66 : vector<2x16xf32>
    %68 = tpu.iota {dimensions = array<i32: 1>} : vector<2x16xi32>
    %69 = vector.broadcast %59 : vector<2x1xf32> to vector<2x16xf32>
    %70 = arith.cmpf oge, %57, %69 : vector<2x16xf32>
    %c16_i32 = arith.constant 16 : i32
    %71 = vector.broadcast %c16_i32 : i32 to vector<2x16xi32>
    %72 = arith.select %70, %68, %71 : vector<2x16xi1>, vector<2x16xi32>
    %cst_45 = arith.constant dense<2147483647> : vector<2xi32>
    %73 = vector.multi_reduction <minsi>, %72, %cst_45 [1] : vector<2x16xi32> to vector<2xi32>
    %74 = vector.shape_cast %73 : vector<2xi32> to vector<2x1xi32>
    %75 = vector.broadcast %74 : vector<2x1xi32> to vector<2x16xi32>
    %76 = arith.cmpi eq, %68, %75 : vector<2x16xi32>
    %77 = arith.extui %76 : vector<2x16xi1> to vector<2x16xi32>
    %78 = arith.sitofp %77 : vector<2x16xi32> to vector<2x16xf32>
    %79 = arith.subf %78, %67 : vector<2x16xf32>
    %80 = arith.addf %79, %67 : vector<2x16xf32>
    %c0_46 = arith.constant 0 : index
    %c0_47 = arith.constant 0 : index
    %81 = vector.load %arg15[%c0_46, %c0_47] : memref<2x16xf32, #tpu.memory_space<vmem>>, vector<2x16xf32>
    tpu.vector_store %arg15[%c0_46, %c0_47], %80 {strides = array<i32>} : memref<2x16xf32, #tpu.memory_space<vmem>>, vector<2x16xf32>,
    return
  }
}

</mosaic_0001>

<bundles_post_ra>
// kernel: _forward_impl.1
= control target key start
LH: loop header
LB: loop body
LE: loop exit
PB: predicated region body
PF: predicated region fallthrough
CT: control target
= control target key end

     0   :  { %s4398_s0 = inlined_call_operand.<no memory space> [shape: f32[1], index: 0, kind: input, shape index: {}]   ;;  %s4399_s1 = inlined_call_operand.vmem [shape: f32[2,1024], index: 1, kind: input, shape index: {}]   ;;  %s4400_s2 = inlined_call_operand.vmem [shape: f32[2,16], index: 2, kind: input, shape index: {}]   ;;  %s4401_s3 = inlined_call_operand.hbm [shape: bf16[1024,512], index: 3, kind: input, shape index: {}]   ;;  %s4402_s4 = inlined_call_operand.vmem [shape: f32[1,512], index: 4, kind: input, shape index: {}]   ;;  %s4403_s5 = inlined_call_operand.hbm [shape: bf16[512,256], index: 5, kind: input, shape index: {}]   ;;  %s4404_s6 = inlined_call_operand.vmem [shape: f32[1,256], index: 6, kind: input, shape index: {}]   ;;  %s4405_s7 = inlined_call_operand.vmem [shape: bf16[256,24], index: 7, kind: input, shape index: {}]   ;;  %s4406_s8 = inlined_call_operand.vmem [shape: f32[1,24], index: 8, kind: input, shape index: {}]   ;;  %s4407_s9 = inlined_call_operand.vmem [shape: f32[24,16], index: 9, kind: input, shape index: {}]   ;;  %s4408_s10 = inlined_call_operand.vmem [shape: f32[1,16], index: 10, kind: input, shape index: {}]   ;;  %s4409_s11 = inlined_call_operand.vmem [shape: f32[16,8], index: 11, kind: input, shape index: {}]   ;;  %s4410_s12 = inlined_call_operand.vmem [shape: f32[1,8], index: 12, kind: input, shape index: {}]   ;;  %s4411_s13 = inlined_call_operand.vmem [shape: f32[8,16], index: 13, kind: input, shape index: {}]   ;;  %s4412_s14 = inlined_call_operand.vmem [shape: f32[1,16], index: 14, kind: input, shape index: {}]   ;;  %s4413_s15 = inlined_call_operand.hbm [shape: f32[2,16], index: 15, kind: output, shape index: {0}]   ;;  %s4414_s16 = inlined_call_operand.hbm [shape: f32[2,16], index: 16, kind: output, shape index: {1}]  }
   0x1   :  { %4415 = sst [smem:[#allocation15_spill]] %s4398_s0 }
   0x2   :  { %23 = vsyncpa [#allocation4], 0 }
   0x3   :  { %24 = vsyncpa [#allocation7], 0 }
   0x4   :  { %25 = vsyncpa [#allocation5], 0 }
   0x5   :  { %26 = vsyncpa [#allocation10], 0  ;;  %s4069_s21 = smov [#allocation3]   ;;  %s3973_s25 = scalar_lea.hbm %s4401_s3, 32768 }
   0x6   :  { %s38_s22 = sshll.u32 %s4069_s21, 4  ;;  %p3974_p0 = scmp.ne.s32.totalorder %s4401_s3, %s3973_s25  ;;  %s39_s22 = int_to_ptr.vmem [resolvable:$true] %s38_s22 }
   0x7   :  { %p3977_p1 = scmp.lt.u32.totalorder %s3973_s25, %s4401_s3 }
   0x9   :  { %p3979_p2 = pnand %p3977_p1, %p3974_p0 }
   0xb   :  { %3982 = shalt.err (!%p3979_p2)
}
   0xc   :  { %s3983_s30 = scalar_lea.vmem %s39_s22, 32768  ;;  %p3988_p4 = scmp.lt.s32.totalorder %s39_s22, %s39_s22 }
   0xd   :  { %p3984_p3 = scmp.ne.s32.totalorder %s39_s22, %s3983_s30  ;;  %p3989_p5 = scmp.lt.s32.totalorder %s3983_s30, %s3983_s30 }
   0xf   :  { %p3990_p6 = por %p3989_p5, %p3988_p4 }
  0x11   :  { %p3991_p7 = pnand %p3990_p6, %p3984_p3 }
  0x13   :  { %3994 = shalt.err (!%p3991_p7)
}
  0x14   :  { %s4070_s0 = smov 256   ;;  %s4071_s17 = smov 16  }
  0x15   :  { %44 = dma.hbm_to_vmem [thread:$0]  %s4401_s3, 32768, %s39_s22, [#allocation4], %s4070_s0, %s4070_s0, %s4071_s17  }
  0x16   :  { %s4072_s20 = smov [#allocation6]   ;;  %s3995_s25 = scalar_lea.hbm %s4403_s5, 8192 }
  0x17   :  { %s52_s21 = sshll.u32 %s4072_s20, 4  ;;  %p3996_p8 = scmp.ne.s32.totalorder %s4403_s5, %s3995_s25  ;;  %s53_s21 = int_to_ptr.vmem [resolvable:$true] %s52_s21 }
  0x18   :  { %p3999_p9 = scmp.lt.u32.totalorder %s3995_s25, %s4403_s5 }
  0x1a   :  { %p4001_p10 = pnand %p3999_p9, %p3996_p8 }
  0x1c   :  { %4004 = shalt.err (!%p4001_p10)
}
  0x1d   :  { %s4005_s30 = scalar_lea.vmem %s53_s21, 8192  ;;  %p4010_p12 = scmp.lt.s32.totalorder %s53_s21, %s53_s21 }
  0x1e   :  { %p4006_p11 = scmp.ne.s32.totalorder %s53_s21, %s4005_s30  ;;  %p4011_p13 = scmp.lt.s32.totalorder %s4005_s30, %s4005_s30 }
  0x20   :  { %p4012_p0 = por %p4011_p13, %p4010_p12 }
  0x22   :  { %p4013_p1 = pnand %p4012_p0, %p4006_p11 }
  0x24   :  { %4016 = shalt.err (!%p4013_p1)
}
  0x25   :  { %s4073_s3 = smov 128   ;;  %s4074_s22 = smov 8  }
  0x26   :  { %58 = dma.hbm_to_vmem [thread:$0]  %s4403_s5, 8192, %s53_s21, [#allocation7], %s4073_s3, %s4073_s3, %s4074_s22  }
  0x27   :  { %4061 = dma.done.wait [#allocation4], 32768  }
  0x28   :  { %4062 = vsyncadd [#allocation4], 4294934528 }
  0x29   :  { %4063 = dma.done.wait [#allocation7], 8192  }
  0x2a   :  { %4064 = vsyncadd [#allocation7], 4294959104  ;;  %v3467_v0 = vld [vmem:[#allocation3 + $0x4] ss:$16 sps:$4 sm:$0xff]   ;;  %v3471_v2 = vld [vmem:[#allocation3] ss:$16 sps:$4 sm:$0xff]   ;;  %v92_v38 = vlaneseq }
  0x2b   :  { %v3469_v1 = vld [vmem:[#allocation3 + $0x204] ss:$16 sps:$4 sm:$0xff]   ;;  %1696 = vmatprep.subr.bf16.mxu1 %v3467_v0  ;;  %v3472_v3 = vld [vmem:[#allocation3 + $0x200] ss:$16 sps:$4 sm:$0xff]   ;;  %v4075_v36 = vmov 1983009808  }
  0x2c   :  { %1737 = vmatprep.subr.bf16.mxu0 %v3469_v1  ;;  %v3473_v4 = vld [vmem:[#allocation3 + $0x24] ss:$16 sps:$4 sm:$0xff]   ;;  %1697 = vmatpush1.bf16.msra.mxu1 %v3471_v2  ;;  %v3477_v6 = vld [vmem:[#allocation3 + $0x20] ss:$16 sps:$4 sm:$0xff]   ;;  %v90_v37 = vunpack.c.l.s4 %v4075_v36  ;;  %v4191_v43 = vshrl.u32 %v92_v38, 7  ;;  %vm4078_vm0 = vmmov 0  }
  0x2d   :  { %1738 = vmatpush1.bf16.msra.mxu0 %v3472_v3  ;;  %v3475_v5 = vld [vmem:[#allocation3 + $0x224] ss:$16 sps:$4 sm:$0xff]   ;;  %1698 = vmatprep.subr.bf16.mxu1 %v3473_v4  ;;  %v3478_v7 = vld [vmem:[#allocation3 + $0x220] ss:$16 sps:$4 sm:$0xff]   ;;  %vm2700_vm1 = vcmask 195584   ;;  %vm2784_vm2 = vcmask 130048  }
  0x2e   :  { %1739 = vmatprep.subr.bf16.mxu0 %v3475_v5  ;;  %v3479_v8 = vld [vmem:[#allocation3 + $0x44] ss:$16 sps:$4 sm:$0xff]   ;;  %v3483_v10 = vld [vmem:[#allocation3 + $0x40] ss:$16 sps:$4 sm:$0xff]   ;;  %v91_v42 = vunpack.c.0.s8 %v90_v37  ;;  %v3599_v37 = vld [vmem:[#allocation3 + $0xac] ss:$16 sps:$4 sm:$0xff]  }
  0x2f   :  { %v3481_v9 = vld [vmem:[#allocation3 + $0x244] ss:$16 sps:$4 sm:$0xff]   ;;  %v3484_v11 = vld [vmem:[#allocation3 + $0x240] ss:$16 sps:$4 sm:$0xff]   ;;  %vm2866_vm3 = vcmask 64512   ;;  %vm2940_vm4 = vcmask 123904  }
  0x30   :  { %1699 = vmatpush1.bf16.msra.mxu1 %v3477_v6  ;;  %v3485_v12 = vld [vmem:[#allocation3 + $0x64] ss:$16 sps:$4 sm:$0xff]   ;;  %v3489_v14 = vld [vmem:[#allocation3 + $0x60] ss:$16 sps:$4 sm:$0xff]   ;;  %v4194_v49 = vsub.s32 %v91_v42, %v4191_v43  ;;  %v3605_v42 = vld [vmem:[#allocation3 + $0xcc] ss:$16 sps:$4 sm:$0xff]  }
  0x31   :  { %1740 = vmatpush1.bf16.msra.mxu0 %v3478_v7  ;;  %1700 = vmatprep.subr.bf16.mxu1 %v3479_v8  ;;  %v3487_v13 = vld [vmem:[#allocation3 + $0x264] ss:$16 sps:$4 sm:$0xff]   ;;  %v3490_v15 = vld [vmem:[#allocation3 + $0x260] ss:$16 sps:$4 sm:$0xff]   ;;  %s4416_s0 = sld [smem:[#allocation15_spill]] }
  0x32   :  { %1741 = vmatprep.subr.bf16.mxu0 %v3481_v9  ;;  %v3491_v16 = vld [vmem:[#allocation3 + $0x84] ss:$16 sps:$4 sm:$0xff]   ;;  %v3495_v18 = vld [vmem:[#allocation3 + $0x80] ss:$16 sps:$4 sm:$0xff]  }
  0x33   :  { %v3493_v17 = vld [vmem:[#allocation3 + $0x284] ss:$16 sps:$4 sm:$0xff]   ;;  %v3496_v19 = vld [vmem:[#allocation3 + $0x280] ss:$16 sps:$4 sm:$0xff]  }
  0x34   :  { %1701 = vmatpush1.bf16.msra.mxu1 %v3483_v10  ;;  %v3497_v20 = vld [vmem:[#allocation3 + $0xa4] ss:$16 sps:$4 sm:$0xff]   ;;  %v3501_v22 = vld [vmem:[#allocation3 + $0xa0] ss:$16 sps:$4 sm:$0xff]  }
  0x35   :  { %1742 = vmatpush1.bf16.msra.mxu0 %v3484_v11  ;;  %1702 = vmatprep.subr.bf16.mxu1 %v3485_v12  ;;  %v3499_v21 = vld [vmem:[#allocation3 + $0x2a4] ss:$16 sps:$4 sm:$0xff]   ;;  %v3502_v23 = vld [vmem:[#allocation3 + $0x2a0] ss:$16 sps:$4 sm:$0xff]  }
  0x36   :  { %1743 = vmatprep.subr.bf16.mxu0 %v3487_v13  ;;  %v3503_v24 = vld [vmem:[#allocation3 + $0xc4] ss:$16 sps:$4 sm:$0xff]   ;;  %v3507_v26 = vld [vmem:[#allocation3 + $0xc0] ss:$16 sps:$4 sm:$0xff]  }
  0x37   :  { %v3505_v25 = vld [vmem:[#allocation3 + $0x2c4] ss:$16 sps:$4 sm:$0xff]   ;;  %v3508_v27 = vld [vmem:[#allocation3 + $0x2c0] ss:$16 sps:$4 sm:$0xff]  }
  0x38   :  { %1703 = vmatpush1.bf16.msra.mxu1 %v3489_v14  ;;  %v3509_v28 = vld [vmem:[#allocation3 + $0xe4] ss:$16 sps:$4 sm:$0xff]   ;;  %v3513_v30 = vld [vmem:[#allocation3 + $0xe0] ss:$16 sps:$4 sm:$0xff]  }
  0x39   :  { %1744 = vmatpush1.bf16.msra.mxu0 %v3490_v15  ;;  %1704 = vmatprep.subr.bf16.mxu1 %v3491_v16  ;;  %v3511_v29 = vld [vmem:[#allocation3 + $0x2e4] ss:$16 sps:$4 sm:$0xff]   ;;  %v3514_v31 = vld [vmem:[#allocation3 + $0x2e0] ss:$16 sps:$4 sm:$0xff]   ;;  %v3569_v15 = vld [vmem:[#allocation3 + $0xc] ss:$16 sps:$4 sm:$0xff]  }
  0x3a   :  { %1745 = vmatprep.subr.bf16.mxu0 %v3493_v17  ;;  %v3515_v32 = vld [vmem:[#allocation3 + $0x104] ss:$16 sps:$4 sm:$0xff]   ;;  %v3519_v34 = vld [vmem:[#allocation3 + $0x100] ss:$16 sps:$4 sm:$0xff]  }
  0x3b   :  { %v3517_v33 = vld [vmem:[#allocation3 + $0x304] ss:$16 sps:$4 sm:$0xff]   ;;  %v3520_v35 = vld [vmem:[#allocation3 + $0x300] ss:$16 sps:$4 sm:$0xff]  }
  0x3c   :  { %1705 = vmatpush1.bf16.msra.mxu1 %v3495_v18  ;;  %v3521_v39 = vld [vmem:[#allocation3 + $0x124] ss:$16 sps:$4 sm:$0xff]   ;;  %v3525_v41 = vld [vmem:[#allocation3 + $0x120] ss:$16 sps:$4 sm:$0xff]  }
  0x3d   :  { %1746 = vmatpush1.bf16.msra.mxu0 %v3496_v19  ;;  %1706 = vmatprep.subr.bf16.mxu1 %v3497_v20  ;;  %v3523_v40 = vld [vmem:[#allocation3 + $0x324] ss:$16 sps:$4 sm:$0xff]   ;;  %v3526_v44 = vld [vmem:[#allocation3 + $0x320] ss:$16 sps:$4 sm:$0xff]   ;;  %v3567_v19 = vld [vmem:[#allocation3 + $0x8] ss:$16 sps:$4 sm:$0xff]  }
  0x3e   :  { %1747 = vmatprep.subr.bf16.mxu0 %v3499_v21  ;;  %v3527_v45 = vld [vmem:[#allocation3 + $0x144] ss:$16 sps:$4 sm:$0xff]   ;;  %v3531_v47 = vld [vmem:[#allocation3 + $0x140] ss:$16 sps:$4 sm:$0xff]   ;;  %v3575_v21 = vld [vmem:[#allocation3 + $0x2c] ss:$16 sps:$4 sm:$0xff]  }
  0x3f   :  { %v3529_v46 = vld [vmem:[#allocation3 + $0x344] ss:$16 sps:$4 sm:$0xff]   ;;  %v3532_v48 = vld [vmem:[#allocation3 + $0x340] ss:$16 sps:$4 sm:$0xff]  }
  0x40   :  { %1707 = vmatpush1.bf16.msra.mxu1 %v3501_v22  ;;  %v3533_v50 = vld [vmem:[#allocation3 + $0x164] ss:$16 sps:$4 sm:$0xff]   ;;  %v3537_v53 = vld [vmem:[#allocation3 + $0x160] ss:$16 sps:$4 sm:$0xff]  }
  0x41   :  { %1748 = vmatpush1.bf16.msra.mxu0 %v3502_v23  ;;  %1708 = vmatprep.subr.bf16.mxu1 %v3503_v24  ;;  %v3535_v51 = vld [vmem:[#allocation3 + $0x364] ss:$16 sps:$4 sm:$0xff]   ;;  %v3538_v56 = vld [vmem:[#allocation3 + $0x360] ss:$16 sps:$4 sm:$0xff]   ;;  %v3573_v23 = vld [vmem:[#allocation3 + $0x28] ss:$16 sps:$4 sm:$0xff]  }
  0x42   :  { %1749 = vmatprep.subr.bf16.mxu0 %v3505_v25  ;;  %v84_v52 = vld [vmem:[%s4399_s1] sm:$0xff]  ;;  %v3581_v25 = vld [vmem:[#allocation3 + $0x4c] ss:$16 sps:$4 sm:$0xff]  }
  0x43   :  { %v95_v54 = vrot.slane %v84_v52, %v4194_v49  ;;  %v88_v55 = vcombine.high %v84_v52, %v84_v52  ;;  %v3539_v57 = vld [vmem:[#allocation3 + $0x184] ss:$16 sps:$4 sm:$0xff]   ;;  %v3543_v61 = vld [vmem:[#allocation3 + $0x180] ss:$16 sps:$4 sm:$0xff]  }
  0x44   :  { %1709 = vmatpush1.bf16.msra.mxu1 %v3507_v26  ;;  %v3541_v58 = vld [vmem:[#allocation3 + $0x384] ss:$16 sps:$4 sm:$0xff]   ;;  %v3544_v0 = vld [vmem:[#allocation3 + $0x380] ss:$16 sps:$4 sm:$0xff]  }
  0x45   :  { %1750 = vmatpush1.bf16.msra.mxu0 %v3508_v27  ;;  %1710 = vmatprep.subr.bf16.mxu1 %v3509_v28  ;;  %v103_v59 = vcombine.high %v95_v54, %v95_v54  ;;  %v102_v60 = vrot.slane %v88_v55, %v4194_v49  ;;  %v3545_v1 = vld [vmem:[#allocation3 + $0x1a4] ss:$16 sps:$4 sm:$0xff]   ;;  %v3549_v4 = vld [vmem:[#allocation3 + $0x1a0] ss:$16 sps:$4 sm:$0xff]   ;;  %v4204_v16 = vpack.c.bf16 %v95_v54, %v95_v54  ;;  %v3579_v27 = vld [vmem:[#allocation3 + $0x48] ss:$16 sps:$4 sm:$0xff]  }
  0x46   :  { %1751 = vmatprep.subr.bf16.mxu0 %v3511_v29  ;;  %v3547_v2 = vld [vmem:[#allocation3 + $0x3a4] ss:$16 sps:$4 sm:$0xff]   ;;  %v3550_v5 = vld [vmem:[#allocation3 + $0x3a0] ss:$16 sps:$4 sm:$0xff]   ;;  %v3587_v29 = vld [vmem:[#allocation3 + $0x6c] ss:$16 sps:$4 sm:$0xff]  }
  0x47   :  { %v131_v62 = vpack.c.bf16 %v103_v59, %v103_v59  ;;  %v104_v63 = vcombine.high %v102_v60, %v102_v60  ;;  %v3551_v6 = vld [vmem:[#allocation3 + $0x1c4] ss:$16 sps:$4 sm:$0xff]   ;;  %v3555_v8 = vld [vmem:[#allocation3 + $0x1c0] ss:$16 sps:$4 sm:$0xff]   ;;  %v4206_v18 = vpack.c.bf16 %v102_v60, %v102_v60  ;;  %v3609_v54 = vld [vmem:[#allocation3 + $0xe8] ss:$16 sps:$4 sm:$0xff]  }
  0x48   :  { %1711 = vmatpush1.bf16.msra.mxu1 %v3513_v30  ;;  %v3553_v7 = vld [vmem:[#allocation3 + $0x3c4] ss:$16 sps:$4 sm:$0xff]   ;;  %v3556_v9 = vld [vmem:[#allocation3 + $0x3c0] ss:$16 sps:$4 sm:$0xff]   ;;  %v3623_v60 = vld [vmem:[#allocation3 + $0x12c] ss:$16 sps:$4 sm:$0xff]  }
  0x49   :  { %1752 = vmatpush1.bf16.msra.mxu0 %v3514_v31  ;;  %1712 = vmatprep.subr.bf16.mxu1 %v3515_v32  ;;  %v4201_v3 = vpack.c.bf16 %v104_v63, %v104_v63  ;;  %v3557_v10 = vld [vmem:[#allocation3 + $0x1e4] ss:$16 sps:$4 sm:$0xff]   ;;  %v3561_v12 = vld [vmem:[#allocation3 + $0x1e0] ss:$16 sps:$4 sm:$0xff]   ;;  %v3585_v31 = vld [vmem:[#allocation3 + $0x68] ss:$16 sps:$4 sm:$0xff]  }
  0x4a   :  { %1753 = vmatprep.subr.bf16.mxu0 %v3517_v33  ;;  %1728 = vmatprep.mubr.bf16.mxu1 %v131_v62  ;;  %v3559_v11 = vld [vmem:[#allocation3 + $0x3e4] ss:$16 sps:$4 sm:$0xff]   ;;  %v3562_v13 = vld [vmem:[#allocation3 + $0x3e0] ss:$16 sps:$4 sm:$0xff]   ;;  %v3593_v33 = vld [vmem:[#allocation3 + $0x8c] ss:$16 sps:$4 sm:$0xff]  }
  0x4b   :  { %1769 = vmatprep.mubr.bf16.mxu0 %v4201_v3  ;;  %v3566_v14 = vld [vmem:[#allocation3 + $0x404] ss:$16 sps:$4 sm:$0xff]   ;;  %v3564_v17 = vld [vmem:[#allocation3 + $0x400] ss:$16 sps:$4 sm:$0xff]  }
  0x4c   :  { %1713 = vmatpush1.bf16.msra.mxu1 %v3519_v34  ;;  %v3572_v20 = vld [vmem:[#allocation3 + $0x424] ss:$16 sps:$4 sm:$0xff]   ;;  %v3570_v22 = vld [vmem:[#allocation3 + $0x420] ss:$16 sps:$4 sm:$0xff]  }
  0x4d   :  { %1754 = vmatpush1.bf16.msra.mxu0 %v3520_v35  ;;  %1714 = vmatprep.subr.bf16.mxu1 %v3521_v39  ;;  %v3578_v24 = vld [vmem:[#allocation3 + $0x444] ss:$16 sps:$4 sm:$0xff]   ;;  %v3576_v26 = vld [vmem:[#allocation3 + $0x440] ss:$16 sps:$4 sm:$0xff]   ;;  %v3591_v35 = vld [vmem:[#allocation3 + $0x88] ss:$16 sps:$4 sm:$0xff]  }
  0x4e   :  { %1755 = vmatprep.subr.bf16.mxu0 %v3523_v40  ;;  %v3584_v28 = vld [vmem:[#allocation3 + $0x464] ss:$16 sps:$4 sm:$0xff]   ;;  %v3582_v30 = vld [vmem:[#allocation3 + $0x460] ss:$16 sps:$4 sm:$0xff]   ;;  %v3597_v40 = vld [vmem:[#allocation3 + $0xa8] ss:$16 sps:$4 sm:$0xff]  }
  0x4f   :  { %v3590_v32 = vld [vmem:[#allocation3 + $0x484] ss:$16 sps:$4 sm:$0xff]   ;;  %v3588_v34 = vld [vmem:[#allocation3 + $0x480] ss:$16 sps:$4 sm:$0xff]  }
  0x50   :  { %1715 = vmatpush1.bf16.msra.mxu1 %v3525_v41  ;;  %v3596_v36 = vld [vmem:[#allocation3 + $0x4a4] ss:$16 sps:$4 sm:$0xff]   ;;  %v3594_v39 = vld [vmem:[#allocation3 + $0x4a0] ss:$16 sps:$4 sm:$0xff]  }
  0x51   :  { %1756 = vmatpush1.bf16.msra.mxu0 %v3526_v44  ;;  %1716 = vmatprep.subr.bf16.mxu1 %v3527_v45  ;;  %v3602_v41 = vld [vmem:[#allocation3 + $0x4c4] ss:$16 sps:$4 sm:$0xff]   ;;  %v4213_v44 = vld [vmem:[%s4399_s1 + $0x8] sm:$0xff] }
  0x52   :  { %1757 = vmatprep.subr.bf16.mxu0 %v3529_v46  ;;  %v4217_v45 = vrot.slane %v4213_v44, %v4194_v49  ;;  %v3600_v46 = vld [vmem:[#allocation3 + $0x4c0] ss:$16 sps:$4 sm:$0xff]   ;;  %v3614_v55 = vld [vmem:[#allocation3 + $0x504] ss:$16 sps:$4 sm:$0xff]  }
  0x53   :  { %v3620_v59 = vld [vmem:[#allocation3 + $0x524] ss:$16 sps:$4 sm:$0xff]  }
  0x54   :  { %1717 = vmatpush1.bf16.msra.mxu1 %v3531_v47  ;;  %v3603_v47 = vld [vmem:[#allocation3 + $0xc8] ss:$16 sps:$4 sm:$0xff]   ;;  %v3626_v63 = vld [vmem:[#allocation3 + $0x544] ss:$16 sps:$4 sm:$0xff]  }
  0x55   :  { %1758 = vmatpush1.bf16.msra.mxu0 %v3532_v48  ;;  %1718 = vmatprep.subr.bf16.mxu1 %v3533_v50  ;;  %v120_v48 = vcombine.high %v4217_v45, %v4217_v45  ;;  %v3608_v50 = vld [vmem:[#allocation3 + $0x4e4] ss:$16 sps:$4 sm:$0xff]  }
  0x56   :  { %1759 = vmatprep.subr.bf16.mxu0 %v3535_v51  ;;  %v3611_v51 = vld [vmem:[#allocation3 + $0xec] ss:$16 sps:$4 sm:$0xff]  }
  0x57   :  { %v4221_v52 = vpack.c.bf16 %v120_v48, %v120_v48  ;;  %v3689_v48 = vld [vmem:[#allocation3 + $0x28c] ss:$16 sps:$4 sm:$0xff]  }
  0x58   :  { %1719 = vmatpush1.bf16.msra.mxu1 %v3537_v53  ;;  %v3606_v53 = vld [vmem:[#allocation3 + $0x4e0] ss:$16 sps:$4 sm:$0xff]  }
  0x59   :  { %1760 = vmatpush1.bf16.msra.mxu0 %v3538_v56  ;;  %1720 = vmatprep.subr.bf16.mxu1 %v3539_v57  ;;  %v3617_v56 = vld [vmem:[#allocation3 + $0x10c] ss:$16 sps:$4 sm:$0xff]   ;;  %v3612_v57 = vld [vmem:[#allocation3 + $0x500] ss:$16 sps:$4 sm:$0xff]  }
  0x5a   :  { %1761 = vmatprep.subr.bf16.mxu0 %v3541_v58  ;;  %v3615_v58 = vld [vmem:[#allocation3 + $0x108] ss:$16 sps:$4 sm:$0xff]  }
  0x5c   :  { %1721 = vmatpush1.bf16.msra.mxu1 %v3543_v61  ;;  %v3618_v61 = vld [vmem:[#allocation3 + $0x520] ss:$16 sps:$4 sm:$0xff]  }
  0x5d   :  { %1762 = vmatpush1.bf16.msra.mxu0 %v3544_v0  ;;  %1722 = vmatprep.subr.bf16.mxu1 %v3545_v1  ;;  %v3629_v0 = vld [vmem:[#allocation3 + $0x14c] ss:$16 sps:$4 sm:$0xff]   ;;  %v3624_v1 = vld [vmem:[#allocation3 + $0x540] ss:$16 sps:$4 sm:$0xff]  }
  0x5e   :  { %1763 = vmatprep.subr.bf16.mxu0 %v3547_v2  ;;  %v3627_v2 = vld [vmem:[#allocation3 + $0x148] ss:$16 sps:$4 sm:$0xff]  }
  0x60   :  { %1723 = vmatpush1.bf16.msra.mxu1 %v3549_v4  ;;  %v3632_v4 = vld [vmem:[#allocation3 + $0x564] ss:$16 sps:$4 sm:$0xff]  }
  0x61   :  { %1764 = vmatpush1.bf16.msra.mxu0 %v3550_v5  ;;  %1724 = vmatprep.subr.bf16.mxu1 %v3551_v6  ;;  %v3635_v5 = vld [vmem:[#allocation3 + $0x16c] ss:$16 sps:$4 sm:$0xff]   ;;  %v3630_v6 = vld [vmem:[#allocation3 + $0x560] ss:$16 sps:$4 sm:$0xff]  }
  0x62   :  { %1765 = vmatprep.subr.bf16.mxu0 %v3553_v7  ;;  %v3633_v7 = vld [vmem:[#allocation3 + $0x168] ss:$16 sps:$4 sm:$0xff]  }
  0x64   :  { %1725 = vmatpush1.bf16.msra.mxu1 %v3555_v8  ;;  %v3638_v8 = vld [vmem:[#allocation3 + $0x584] ss:$16 sps:$4 sm:$0xff]  }
  0x65   :  { %1766 = vmatpush1.bf16.msra.mxu0 %v3556_v9  ;;  %1726 = vmatprep.subr.bf16.mxu1 %v3557_v10  ;;  %v3641_v9 = vld [vmem:[#allocation3 + $0x18c] ss:$16 sps:$4 sm:$0xff]   ;;  %v3636_v10 = vld [vmem:[#allocation3 + $0x580] ss:$16 sps:$4 sm:$0xff]  }
  0x66   :  { %1767 = vmatprep.subr.bf16.mxu0 %v3559_v11  ;;  %v3639_v11 = vld [vmem:[#allocation3 + $0x188] ss:$16 sps:$4 sm:$0xff]  }
  0x68   :  { %1727 = vmatpush1.bf16.msra.mxu1 %v3561_v12  ;;  %v3644_v12 = vld [vmem:[#allocation3 + $0x5a4] ss:$16 sps:$4 sm:$0xff]  }
  0x69   :  { %1768 = vmatpush1.bf16.msra.mxu0 %v3562_v13  ;;  %1860 = vmatprep.subr.bf16.mxu1 %v3569_v15  ;;  %v3647_v13 = vld [vmem:[#allocation3 + $0x1ac] ss:$16 sps:$4 sm:$0xff]   ;;  %v3645_v15 = vld [vmem:[#allocation3 + $0x1a8] ss:$16 sps:$4 sm:$0xff]  }
  0x6a   :  { %1778 = vmatprep.subr.bf16.mxu0 %v3566_v14  ;;  %v3642_v14 = vld [vmem:[#allocation3 + $0x5a0] ss:$16 sps:$4 sm:$0xff]  }
  0x6b   :  { %1729 = vmatmul.mubr.bf16.vlgmr.msra.gmra.mrb[0].mxu1 %v4204_v16 }
  0x6c   :  { %1770 = vmatmul.mubr.bf16.vlgmr.msra.gmra.mrb[0].mxu0 %v4206_v18  ;;  %1861 = vmatpush1.bf16.msra.mxu1 %v3567_v19  ;;  %v3653_v19 = vld [vmem:[#allocation3 + $0x1cc] ss:$16 sps:$4 sm:$0xff]  }
  0x6d   :  { %1779 = vmatpush1.bf16.msra.mxu0 %v3564_v17  ;;  %1862 = vmatprep.subr.bf16.mxu1 %v3575_v21  ;;  %v3650_v17 = vld [vmem:[#allocation3 + $0x5c4] ss:$16 sps:$4 sm:$0xff]   ;;  %v3648_v21 = vld [vmem:[#allocation3 + $0x5c0] ss:$16 sps:$4 sm:$0xff]  }
  0x6e   :  { %1780 = vmatprep.subr.bf16.mxu0 %v3572_v20  ;;  %1892 = vmatprep.mubr.bf16.mxu1 %v131_v62  ;;  %v3621_v62 = vld [vmem:[#allocation3 + $0x128] ss:$16 sps:$4 sm:$0xff]   ;;  %v105_v20 = vcombine.high %v4213_v44, %v4213_v44  ;;  %v3680_v44 = vld [vmem:[#allocation3 + $0x664] ss:$16 sps:$4 sm:$0xff]  }
  0x6f   :  { %1810 = vmatprep.mubr.bf16.mxu0 %v4221_v52 }
  0x70   :  { %1863 = vmatpush1.bf16.msra.mxu1 %v3573_v23  ;;  %v3656_v23 = vld [vmem:[#allocation3 + $0x5e4] ss:$16 sps:$4 sm:$0xff]  }
  0x71   :  { %1781 = vmatpush1.bf16.msra.mxu0 %v3570_v22  ;;  %1864 = vmatprep.subr.bf16.mxu1 %v3581_v25  ;;  %v3651_v22 = vld [vmem:[#allocation3 + $0x1c8] ss:$16 sps:$4 sm:$0xff]   ;;  %v4227_v25 = vrot.slane %v105_v20, %v4194_v49  ;;  %v3737_v20 = vld [vmem:[#allocation3 + $0x38c] ss:$16 sps:$4 sm:$0xff]  }
  0x72   :  { %1782 = vmatprep.subr.bf16.mxu0 %v3578_v24  ;;  %v3659_v24 = vld [vmem:[#allocation3 + $0x1ec] ss:$16 sps:$4 sm:$0xff]   ;;  %v3663_v49 = vld [vmem:[#allocation3 + $0x208] ss:$16 sps:$4 sm:$0xff]  }
  0x74   :  { %1865 = vmatpush1.bf16.msra.mxu1 %v3579_v27  ;;  %v3657_v27 = vld [vmem:[#allocation3 + $0x1e8] ss:$16 sps:$4 sm:$0xff]  }
  0x75   :  { %1783 = vmatpush1.bf16.msra.mxu0 %v3576_v26  ;;  %1866 = vmatprep.subr.bf16.mxu1 %v3587_v29  ;;  %v3654_v26 = vld [vmem:[#allocation3 + $0x5e0] ss:$16 sps:$4 sm:$0xff]   ;;  %v3665_v29 = vld [vmem:[#allocation3 + $0x20c] ss:$16 sps:$4 sm:$0xff]  }
  0x76   :  { %1784 = vmatprep.subr.bf16.mxu0 %v3584_v28  ;;  %v3662_v28 = vld [vmem:[#allocation3 + $0x604] ss:$16 sps:$4 sm:$0xff]  }
  0x78   :  { %1867 = vmatpush1.bf16.msra.mxu1 %v3585_v31  ;;  %v4233_v31 = vpack.c.bf16 %v4217_v45, %v4217_v45  ;;  %v3678_v45 = vld [vmem:[#allocation3 + $0x660] ss:$16 sps:$4 sm:$0xff]  }
  0x79   :  { %1785 = vmatpush1.bf16.msra.mxu0 %v3582_v30  ;;  %1868 = vmatprep.subr.bf16.mxu1 %v3593_v33  ;;  %v121_v30 = vcombine.high %v4227_v25, %v4227_v25  ;;  %v3668_v33 = vld [vmem:[#allocation3 + $0x624] ss:$16 sps:$4 sm:$0xff]  }
  0x7a   :  { %1786 = vmatprep.subr.bf16.mxu0 %v3590_v32  ;;  %v3660_v32 = vld [vmem:[#allocation3 + $0x600] ss:$16 sps:$4 sm:$0xff]  }
  0x7c   :  { %1869 = vmatpush1.bf16.msra.mxu1 %v3591_v35  ;;  %v4235_v35 = vpack.c.bf16 %v121_v30, %v121_v30  ;;  %v3744_v30 = vld [vmem:[#allocation3 + $0x7c0] ss:$16 sps:$4 sm:$0xff]  }
  0x7d   :  { %1787 = vmatpush1.bf16.msra.mxu0 %v3588_v34  ;;  %1870 = vmatprep.subr.bf16.mxu1 %v3599_v37  ;;  %v3671_v34 = vld [vmem:[#allocation3 + $0x22c] ss:$16 sps:$4 sm:$0xff]   ;;  %v3669_v37 = vld [vmem:[#allocation3 + $0x228] ss:$16 sps:$4 sm:$0xff]  }
  0x7e   :  { %1788 = vmatprep.subr.bf16.mxu0 %v3596_v36  ;;  %v3666_v36 = vld [vmem:[#allocation3 + $0x620] ss:$16 sps:$4 sm:$0xff]  }
  0x80   :  { %1871 = vmatpush1.bf16.msra.mxu1 %v3597_v40  ;;  %v3677_v40 = vld [vmem:[#allocation3 + $0x24c] ss:$16 sps:$4 sm:$0xff]  }
  0x81   :  { %1789 = vmatpush1.bf16.msra.mxu0 %v3594_v39  ;;  %1872 = vmatprep.subr.bf16.mxu1 %v3605_v42  ;;  %v3674_v39 = vld [vmem:[#allocation3 + $0x644] ss:$16 sps:$4 sm:$0xff]   ;;  %v3675_v42 = vld [vmem:[#allocation3 + $0x248] ss:$16 sps:$4 sm:$0xff]  }
  0x82   :  { %1790 = vmatprep.subr.bf16.mxu0 %v3602_v41  ;;  %v3672_v41 = vld [vmem:[#allocation3 + $0x640] ss:$16 sps:$4 sm:$0xff]  }
  0x84   :  { %1873 = vmatpush1.bf16.msra.mxu1 %v3603_v47  ;;  %v3686_v47 = vld [vmem:[#allocation3 + $0x684] ss:$16 sps:$4 sm:$0xff]  }
  0x85   :  { %1791 = vmatpush1.bf16.msra.mxu0 %v3600_v46  ;;  %1874 = vmatprep.subr.bf16.mxu1 %v3611_v51  ;;  %v3681_v46 = vld [vmem:[#allocation3 + $0x268] ss:$16 sps:$4 sm:$0xff]   ;;  %v3692_v51 = vld [vmem:[#allocation3 + $0x6a4] ss:$16 sps:$4 sm:$0xff]  }
  0x86   :  { %1792 = vmatprep.subr.bf16.mxu0 %v3608_v50  ;;  %v3684_v50 = vld [vmem:[#allocation3 + $0x680] ss:$16 sps:$4 sm:$0xff]  }
  0x88   :  { %1875 = vmatpush1.bf16.msra.mxu1 %v3609_v54  ;;  %v3690_v54 = vld [vmem:[#allocation3 + $0x6a0] ss:$16 sps:$4 sm:$0xff]  }
  0x89   :  { %1793 = vmatpush1.bf16.msra.mxu0 %v3606_v53  ;;  %1876 = vmatprep.subr.bf16.mxu1 %v3617_v56  ;;  %v3695_v53 = vld [vmem:[#allocation3 + $0x2ac] ss:$16 sps:$4 sm:$0xff]   ;;  %v3698_v56 = vld [vmem:[#allocation3 + $0x6c4] ss:$16 sps:$4 sm:$0xff]  }
  0x8a   :  { %1794 = vmatprep.subr.bf16.mxu0 %v3614_v55  ;;  %v3693_v55 = vld [vmem:[#allocation3 + $0x2a8] ss:$16 sps:$4 sm:$0xff]  }
  0x8c   :  { %1877 = vmatpush1.bf16.msra.mxu1 %v3615_v58  ;;  %v3696_v58 = vld [vmem:[#allocation3 + $0x6c0] ss:$16 sps:$4 sm:$0xff]  }
  0x8d   :  { %1795 = vmatpush1.bf16.msra.mxu0 %v3612_v57  ;;  %1878 = vmatprep.subr.bf16.mxu1 %v3623_v60  ;;  %v3701_v57 = vld [vmem:[#allocation3 + $0x2cc] ss:$16 sps:$4 sm:$0xff]   ;;  %v3704_v60 = vld [vmem:[#allocation3 + $0x6e4] ss:$16 sps:$4 sm:$0xff]  }
  0x8e   :  { %1796 = vmatprep.subr.bf16.mxu0 %v3620_v59  ;;  %v3699_v59 = vld [vmem:[#allocation3 + $0x2c8] ss:$16 sps:$4 sm:$0xff]  }
  0x90   :  { %1879 = vmatpush1.bf16.msra.mxu1 %v3621_v62  ;;  %v3702_v62 = vld [vmem:[#allocation3 + $0x6e0] ss:$16 sps:$4 sm:$0xff]  }
  0x91   :  { %1797 = vmatpush1.bf16.msra.mxu0 %v3618_v61  ;;  %1880 = vmatprep.subr.bf16.mxu1 %v3629_v0  ;;  %v3707_v61 = vld [vmem:[#allocation3 + $0x2ec] ss:$16 sps:$4 sm:$0xff]   ;;  %v3710_v0 = vld [vmem:[#allocation3 + $0x704] ss:$16 sps:$4 sm:$0xff]  }
  0x92   :  { %1798 = vmatprep.subr.bf16.mxu0 %v3626_v63  ;;  %v3705_v63 = vld [vmem:[#allocation3 + $0x2e8] ss:$16 sps:$4 sm:$0xff]  }
  0x94   :  { %1881 = vmatpush1.bf16.msra.mxu1 %v3627_v2  ;;  %v3708_v2 = vld [vmem:[#allocation3 + $0x700] ss:$16 sps:$4 sm:$0xff]  }
  0x95   :  { %1799 = vmatpush1.bf16.msra.mxu0 %v3624_v1  ;;  %1882 = vmatprep.subr.bf16.mxu1 %v3635_v5  ;;  %v3713_v1 = vld [vmem:[#allocation3 + $0x30c] ss:$16 sps:$4 sm:$0xff]   ;;  %v3716_v5 = vld [vmem:[#allocation3 + $0x724] ss:$16 sps:$4 sm:$0xff]  }
  0x96   :  { %1800 = vmatprep.subr.bf16.mxu0 %v3632_v4  ;;  %v3711_v4 = vld [vmem:[#allocation3 + $0x308] ss:$16 sps:$4 sm:$0xff]  }
  0x98   :  { %1883 = vmatpush1.bf16.msra.mxu1 %v3633_v7  ;;  %v3714_v7 = vld [vmem:[#allocation3 + $0x720] ss:$16 sps:$4 sm:$0xff]  }
  0x99   :  { %1801 = vmatpush1.bf16.msra.mxu0 %v3630_v6  ;;  %1884 = vmatprep.subr.bf16.mxu1 %v3641_v9  ;;  %v3719_v6 = vld [vmem:[#allocation3 + $0x32c] ss:$16 sps:$4 sm:$0xff]   ;;  %v3722_v9 = vld [vmem:[#allocation3 + $0x744] ss:$16 sps:$4 sm:$0xff]  }
  0x9a   :  { %1802 = vmatprep.subr.bf16.mxu0 %v3638_v8  ;;  %v3717_v8 = vld [vmem:[#allocation3 + $0x328] ss:$16 sps:$4 sm:$0xff]  }
  0x9c   :  { %1885 = vmatpush1.bf16.msra.mxu1 %v3639_v11  ;;  %v3720_v11 = vld [vmem:[#allocation3 + $0x740] ss:$16 sps:$4 sm:$0xff]  }
  0x9d   :  { %1803 = vmatpush1.bf16.msra.mxu0 %v3636_v10  ;;  %1886 = vmatprep.subr.bf16.mxu1 %v3647_v13  ;;  %v3725_v10 = vld [vmem:[#allocation3 + $0x34c] ss:$16 sps:$4 sm:$0xff]   ;;  %v3728_v13 = vld [vmem:[#allocation3 + $0x764] ss:$16 sps:$4 sm:$0xff]  }
  0x9e   :  { %1804 = vmatprep.subr.bf16.mxu0 %v3644_v12  ;;  %v3723_v12 = vld [vmem:[#allocation3 + $0x348] ss:$16 sps:$4 sm:$0xff]  }
  0xa0   :  { %1887 = vmatpush1.bf16.msra.mxu1 %v3645_v15  ;;  %v3726_v15 = vld [vmem:[#allocation3 + $0x760] ss:$16 sps:$4 sm:$0xff]  }
  0xa1   :  { %1805 = vmatpush1.bf16.msra.mxu0 %v3642_v14  ;;  %1888 = vmatprep.subr.bf16.mxu1 %v3653_v19  ;;  %v3731_v14 = vld [vmem:[#allocation3 + $0x36c] ss:$16 sps:$4 sm:$0xff]   ;;  %v3734_v19 = vld [vmem:[#allocation3 + $0x784] ss:$16 sps:$4 sm:$0xff]  }
  0xa2   :  { %1806 = vmatprep.subr.bf16.mxu0 %v3650_v17  ;;  %v3729_v17 = vld [vmem:[#allocation3 + $0x368] ss:$16 sps:$4 sm:$0xff]  }
  0xa4   :  { %1889 = vmatpush1.bf16.msra.mxu1 %v3651_v22  ;;  %v3735_v22 = vld [vmem:[#allocation3 + $0x388] ss:$16 sps:$4 sm:$0xff]  }
  0xa5   :  { %1807 = vmatpush1.bf16.msra.mxu0 %v3648_v21  ;;  %1890 = vmatprep.subr.bf16.mxu1 %v3659_v24  ;;  %v3732_v21 = vld [vmem:[#allocation3 + $0x780] ss:$16 sps:$4 sm:$0xff]   ;;  %v3743_v24 = vld [vmem:[#allocation3 + $0x3ac] ss:$16 sps:$4 sm:$0xff]  }
  0xa6   :  { %1808 = vmatprep.subr.bf16.mxu0 %v3656_v23  ;;  %v3740_v23 = vld [vmem:[#allocation3 + $0x7a4] ss:$16 sps:$4 sm:$0xff]  }
  0xa8   :  { %1891 = vmatpush1.bf16.msra.mxu1 %v3657_v27  ;;  %v3741_v27 = vld [vmem:[#allocation3 + $0x3a8] ss:$16 sps:$4 sm:$0xff]  }
  0xa9   :  { %1809 = vmatpush1.bf16.msra.mxu0 %v3654_v26  ;;  %1901 = vmatprep.subr.bf16.mxu1 %v3665_v29  ;;  %v3738_v26 = vld [vmem:[#allocation3 + $0x7a0] ss:$16 sps:$4 sm:$0xff]   ;;  %v3749_v29 = vld [vmem:[#allocation3 + $0x3cc] ss:$16 sps:$4 sm:$0xff]  }
  0xaa   :  { %1819 = vmatprep.subr.bf16.mxu0 %v3662_v28  ;;  %v3746_v28 = vld [vmem:[#allocation3 + $0x7c4] ss:$16 sps:$4 sm:$0xff]  }
  0xab   :  { %1893 = vmatmul.mubr.bf16.vlgmr.msra.gmra.mrb[4].mxu1 %v4204_v16  ;;  %v3683_v16 = vld [vmem:[#allocation3 + $0x26c] ss:$16 sps:$4 sm:$0xff]  }
  0xac   :  { %1811 = vmatmul.mubr.bf16.vlgmr.msra.gmra.mrb[0].mxu0 %v4233_v31  ;;  %1902 = vmatpush1.bf16.msra.mxu1 %v3663_v49  ;;  %v3752_v49 = vld [vmem:[#allocation3 + $0x7e4] ss:$16 sps:$4 sm:$0xff]  }
  0xad   :  { %1820 = vmatpush1.bf16.msra.mxu0 %v3660_v32  ;;  %1903 = vmatprep.subr.bf16.mxu1 %v3671_v34  ;;  %v3747_v32 = vld [vmem:[#allocation3 + $0x3c8] ss:$16 sps:$4 sm:$0xff]   ;;  %v3750_v34 = vld [vmem:[#allocation3 + $0x7e0] ss:$16 sps:$4 sm:$0xff]  }
  0xae   :  { %1821 = vmatprep.subr.bf16.mxu0 %v3668_v33  ;;  %1851 = vmatprep.mubr.bf16.mxu0 %v4235_v35  ;;  %v3755_v33 = vld [vmem:[#allocation3 + $0x3ec] ss:$16 sps:$4 sm:$0xff]  }
  0xaf   :  { %1933 = vmatprep.mubr.bf16.mxu1 %v4201_v3  ;;  %v3687_v3 = vld [vmem:[#allocation3 + $0x288] ss:$16 sps:$4 sm:$0xff]  }
  0xb0   :  { %1904 = vmatpush1.bf16.msra.mxu1 %v3669_v37  ;;  %v3759_v37 = vld [vmem:[#allocation3 + $0x40c] ss:$16 sps:$4 sm:$0xff]  }
  0xb1   :  { %1822 = vmatpush1.bf16.msra.mxu0 %v3666_v36  ;;  %1905 = vmatprep.subr.bf16.mxu1 %v3677_v40  ;;  %v3753_v36 = vld [vmem:[#allocation3 + $0x3e8] ss:$16 sps:$4 sm:$0xff]   ;;  %v4243_v40 = vpack.c.bf16 %v4227_v25, %v4227_v25 }
  0xb2   :  { %1823 = vmatprep.subr.bf16.mxu0 %v3674_v39  ;;  %v3757_v39 = vld [vmem:[#allocation3 + $0x408] ss:$16 sps:$4 sm:$0xff]  }
  0xb3   :  { %v3856_v25 = vld [vmem:[#allocation6 + $0x10] ss:$8 sps:$4 sm:$0xff]  }
  0xb4   :  { %1906 = vmatpush1.bf16.msra.mxu1 %v3675_v42  ;;  %v3853_v42 = vld [vmem:[#allocation6] ss:$8 sps:$4 sm:$0xff]  }
  0xb5   :  { %1824 = vmatpush1.bf16.msra.mxu0 %v3672_v41  ;;  %1907 = vmatprep.subr.bf16.mxu1 %v3683_v16  ;;  %v3762_v41 = vld [vmem:[#allocation3 + $0x42c] ss:$16 sps:$4 sm:$0xff]   ;;  %v3760_v16 = vld [vmem:[#allocation3 + $0x428] ss:$16 sps:$4 sm:$0xff]  }
  0xb6   :  { %1825 = vmatprep.subr.bf16.mxu0 %v3680_v44  ;;  %v3855_v44 = vld [vmem:[#allocation6 + $0x4] ss:$8 sps:$4 sm:$0xff]  }
  0xb8   :  { %1908 = vmatpush1.bf16.msra.mxu1 %v3681_v46  ;;  %v3765_v46 = vld [vmem:[#allocation3 + $0x44c] ss:$16 sps:$4 sm:$0xff]  }
  0xb9   :  { %1826 = vmatpush1.bf16.msra.mxu0 %v3678_v45  ;;  %1909 = vmatprep.subr.bf16.mxu1 %v3689_v48  ;;  %v3858_v45 = vld [vmem:[#allocation6 + $0x14] ss:$8 sps:$4 sm:$0xff]   ;;  %v3763_v48 = vld [vmem:[#allocation3 + $0x448] ss:$16 sps:$4 sm:$0xff]  }
  0xba   :  { %1827 = vmatprep.subr.bf16.mxu0 %v3686_v47  ;;  %v3861_v47 = vld [vmem:[#allocation6 + $0x24] ss:$8 sps:$4 sm:$0xff]  }
  0xbc   :  { %1910 = vmatpush1.bf16.msra.mxu1 %v3687_v3  ;;  %v3766_v3 = vld [vmem:[#allocation3 + $0x468] ss:$16 sps:$4 sm:$0xff]  }
  0xbd   :  { %1828 = vmatpush1.bf16.msra.mxu0 %v3684_v50  ;;  %1911 = vmatprep.subr.bf16.mxu1 %v3695_v53  ;;  %v3768_v50 = vld [vmem:[#allocation3 + $0x46c] ss:$16 sps:$4 sm:$0xff]  }
  0xbe   :  { %1829 = vmatprep.subr.bf16.mxu0 %v3692_v51  ;;  %v3771_v51 = vld [vmem:[#allocation3 + $0x48c] ss:$16 sps:$4 sm:$0xff]  }
  0xbf   :  { %v3864_v53 = vld [vmem:[#allocation6 + $0x34] ss:$8 sps:$4 sm:$0xff]  }
  0xc0   :  { %1912 = vmatpush1.bf16.msra.mxu1 %v3693_v55  ;;  %v3769_v55 = vld [vmem:[#allocation3 + $0x488] ss:$16 sps:$4 sm:$0xff]  }
  0xc1   :  { %1830 = vmatpush1.bf16.msra.mxu0 %v3690_v54  ;;  %1913 = vmatprep.subr.bf16.mxu1 %v3701_v57  ;;  %v3867_v54 = vld [vmem:[#allocation6 + $0x44] ss:$8 sps:$4 sm:$0xff]   ;;  %v3865_v57 = vld [vmem:[#allocation6 + $0x40] ss:$8 sps:$4 sm:$0xff]  }
  0xc2   :  { %1831 = vmatprep.subr.bf16.mxu0 %v3698_v56  ;;  %v3774_v56 = vld [vmem:[#allocation3 + $0x4ac] ss:$16 sps:$4 sm:$0xff]  }
  0xc4   :  { %1914 = vmatpush1.bf16.msra.mxu1 %v3699_v59  ;;  %v3772_v59 = vld [vmem:[#allocation3 + $0x4a8] ss:$16 sps:$4 sm:$0xff]  }
  0xc5   :  { %1832 = vmatpush1.bf16.msra.mxu0 %v3696_v58  ;;  %1915 = vmatprep.subr.bf16.mxu1 %v3707_v61  ;;  %v3870_v58 = vld [vmem:[#allocation6 + $0x54] ss:$8 sps:$4 sm:$0xff]   ;;  %v3868_v61 = vld [vmem:[#allocation6 + $0x50] ss:$8 sps:$4 sm:$0xff]  }
  0xc6   :  { %1833 = vmatprep.subr.bf16.mxu0 %v3704_v60  ;;  %v3777_v60 = vld [vmem:[#allocation3 + $0x4cc] ss:$16 sps:$4 sm:$0xff]  }
  0xc8   :  { %1916 = vmatpush1.bf16.msra.mxu1 %v3705_v63  ;;  %v3775_v63 = vld [vmem:[#allocation3 + $0x4c8] ss:$16 sps:$4 sm:$0xff]  }
  0xc9   :  { %1834 = vmatpush1.bf16.msra.mxu0 %v3702_v62  ;;  %1917 = vmatprep.subr.bf16.mxu1 %v3713_v1  ;;  %v3873_v62 = vld [vmem:[#allocation6 + $0x64] ss:$8 sps:$4 sm:$0xff]   ;;  %v3871_v1 = vld [vmem:[#allocation6 + $0x60] ss:$8 sps:$4 sm:$0xff]  }
  0xca   :  { %1835 = vmatprep.subr.bf16.mxu0 %v3710_v0  ;;  %v3780_v0 = vld [vmem:[#allocation3 + $0x4ec] ss:$16 sps:$4 sm:$0xff]  }
  0xcc   :  { %1918 = vmatpush1.bf16.msra.mxu1 %v3711_v4  ;;  %v3778_v4 = vld [vmem:[#allocation3 + $0x4e8] ss:$16 sps:$4 sm:$0xff]  }
  0xcd   :  { %1836 = vmatpush1.bf16.msra.mxu0 %v3708_v2  ;;  %1919 = vmatprep.subr.bf16.mxu1 %v3719_v6  ;;  %v3876_v2 = vld [vmem:[#allocation6 + $0x74] ss:$8 sps:$4 sm:$0xff]   ;;  %v3874_v6 = vld [vmem:[#allocation6 + $0x70] ss:$8 sps:$4 sm:$0xff]  }
  0xce   :  { %1837 = vmatprep.subr.bf16.mxu0 %v3716_v5  ;;  %v3783_v5 = vld [vmem:[#allocation3 + $0x50c] ss:$16 sps:$4 sm:$0xff]  }
  0xd0   :  { %1920 = vmatpush1.bf16.msra.mxu1 %v3717_v8  ;;  %v3781_v8 = vld [vmem:[#allocation3 + $0x508] ss:$16 sps:$4 sm:$0xff]  }
  0xd1   :  { %1838 = vmatpush1.bf16.msra.mxu0 %v3714_v7  ;;  %1921 = vmatprep.subr.bf16.mxu1 %v3725_v10  ;;  %v3879_v7 = vld [vmem:[#allocation6 + $0x84] ss:$8 sps:$4 sm:$0xff]   ;;  %v3877_v10 = vld [vmem:[#allocation6 + $0x80] ss:$8 sps:$4 sm:$0xff]  }
  0xd2   :  { %1839 = vmatprep.subr.bf16.mxu0 %v3722_v9  ;;  %v3786_v9 = vld [vmem:[#allocation3 + $0x52c] ss:$16 sps:$4 sm:$0xff]  }
  0xd4   :  { %1922 = vmatpush1.bf16.msra.mxu1 %v3723_v12  ;;  %v3784_v12 = vld [vmem:[#allocation3 + $0x528] ss:$16 sps:$4 sm:$0xff]  }
  0xd5   :  { %1840 = vmatpush1.bf16.msra.mxu0 %v3720_v11  ;;  %1923 = vmatprep.subr.bf16.mxu1 %v3731_v14  ;;  %v3882_v11 = vld [vmem:[#allocation6 + $0x94] ss:$8 sps:$4 sm:$0xff]   ;;  %v3880_v14 = vld [vmem:[#allocation6 + $0x90] ss:$8 sps:$4 sm:$0xff]  }
  0xd6   :  { %1841 = vmatprep.subr.bf16.mxu0 %v3728_v13  ;;  %v3789_v13 = vld [vmem:[#allocation3 + $0x54c] ss:$16 sps:$4 sm:$0xff]  }
  0xd8   :  { %1924 = vmatpush1.bf16.msra.mxu1 %v3729_v17  ;;  %v3787_v17 = vld [vmem:[#allocation3 + $0x548] ss:$16 sps:$4 sm:$0xff]  }
  0xd9   :  { %1842 = vmatpush1.bf16.msra.mxu0 %v3726_v15  ;;  %1925 = vmatprep.subr.bf16.mxu1 %v3737_v20  ;;  %v3885_v15 = vld [vmem:[#allocation6 + $0xa4] ss:$8 sps:$4 sm:$0xff]   ;;  %v3883_v20 = vld [vmem:[#allocation6 + $0xa0] ss:$8 sps:$4 sm:$0xff]  }
  0xda   :  { %1843 = vmatprep.subr.bf16.mxu0 %v3734_v19  ;;  %v3792_v19 = vld [vmem:[#allocation3 + $0x56c] ss:$16 sps:$4 sm:$0xff]  }
  0xdc   :  { %1926 = vmatpush1.bf16.msra.mxu1 %v3735_v22  ;;  %v3790_v22 = vld [vmem:[#allocation3 + $0x568] ss:$16 sps:$4 sm:$0xff]  }
  0xdd   :  { %1844 = vmatpush1.bf16.msra.mxu0 %v3732_v21  ;;  %1927 = vmatprep.subr.bf16.mxu1 %v3743_v24  ;;  %v3888_v21 = vld [vmem:[#allocation6 + $0xb4] ss:$8 sps:$4 sm:$0xff]   ;;  %v3886_v24 = vld [vmem:[#allocation6 + $0xb0] ss:$8 sps:$4 sm:$0xff]  }
  0xde   :  { %1845 = vmatprep.subr.bf16.mxu0 %v3740_v23  ;;  %v3795_v23 = vld [vmem:[#allocation3 + $0x58c] ss:$16 sps:$4 sm:$0xff]  }
  0xe0   :  { %1928 = vmatpush1.bf16.msra.mxu1 %v3741_v27  ;;  %v3793_v27 = vld [vmem:[#allocation3 + $0x588] ss:$16 sps:$4 sm:$0xff]  }
  0xe1   :  { %1846 = vmatpush1.bf16.msra.mxu0 %v3738_v26  ;;  %1929 = vmatprep.subr.bf16.mxu1 %v3749_v29  ;;  %v3891_v26 = vld [vmem:[#allocation6 + $0xc4] ss:$8 sps:$4 sm:$0xff]   ;;  %v3889_v29 = vld [vmem:[#allocation6 + $0xc0] ss:$8 sps:$4 sm:$0xff]  }
  0xe2   :  { %1847 = vmatprep.subr.bf16.mxu0 %v3746_v28  ;;  %v3798_v28 = vld [vmem:[#allocation3 + $0x5ac] ss:$16 sps:$4 sm:$0xff]  }
  0xe4   :  { %1930 = vmatpush1.bf16.msra.mxu1 %v3747_v32  ;;  %v3796_v32 = vld [vmem:[#allocation3 + $0x5a8] ss:$16 sps:$4 sm:$0xff]  }
  0xe5   :  { %1848 = vmatpush1.bf16.msra.mxu0 %v3744_v30  ;;  %1931 = vmatprep.subr.bf16.mxu1 %v3755_v33  ;;  %v3894_v30 = vld [vmem:[#allocation6 + $0xd4] ss:$8 sps:$4 sm:$0xff]   ;;  %v3892_v33 = vld [vmem:[#allocation6 + $0xd0] ss:$8 sps:$4 sm:$0xff]  }
  0xe6   :  { %1849 = vmatprep.subr.bf16.mxu0 %v3752_v49  ;;  %v3801_v49 = vld [vmem:[#allocation3 + $0x5cc] ss:$16 sps:$4 sm:$0xff]  }
  0xe8   :  { %1932 = vmatpush1.bf16.msra.mxu1 %v3753_v36  ;;  %v3804_v36 = vld [vmem:[#allocation3 + $0x5ec] ss:$16 sps:$4 sm:$0xff]  }
  0xe9   :  { %1850 = vmatpush1.bf16.msra.mxu0 %v3750_v34  ;;  %1942 = vmatprep.subr.bf16.mxu1 %v3759_v37  ;;  %v3799_v34 = vld [vmem:[#allocation3 + $0x5c8] ss:$16 sps:$4 sm:$0xff]  }
  0xea   :  { %2428 = vmatprep.subr.bf16.mxu0 %v3855_v44  ;;  %v3802_v37 = vld [vmem:[#allocation3 + $0x5e8] ss:$16 sps:$4 sm:$0xff]  }
  0xeb   :  { %1934 = vmatmul.mubr.bf16.vlgmr.msra.gmra.mrb[4].mxu1 %v4206_v18  ;;  %v3859_v18 = vld [vmem:[#allocation6 + $0x20] ss:$8 sps:$4 sm:$0xff]  }
  0xec   :  { %1852 = vmatmul.mubr.bf16.vlgmr.msra.gmra.mrb[0].mxu0 %v4243_v40  ;;  %1943 = vmatpush1.bf16.msra.mxu1 %v3757_v39  ;;  %v3807_v39 = vld [vmem:[#allocation3 + $0x60c] ss:$16 sps:$4 sm:$0xff]   ;;  %v3808_v44 = vld [vmem:[#allocation3 + $0x628] ss:$16 sps:$4 sm:$0xff]  }
  0xed   :  { %1974 = vmatprep.mubr.bf16.mxu1 %v4221_v52  ;;  %1944 = vmatprep.subr.bf16.mxu1 %v3762_v41  ;;  %v3862_v52 = vld [vmem:[#allocation6 + $0x30] ss:$8 sps:$4 sm:$0xff]  }
  0xee   :  { %2429 = vmatpush1.bf16.msra.mxu0 %v3853_v42  ;;  %v3805_v41 = vld [vmem:[#allocation3 + $0x608] ss:$16 sps:$4 sm:$0xff]   ;;  %v3810_v42 = vld [vmem:[#allocation3 + $0x62c] ss:$16 sps:$4 sm:$0xff]  }
  0xef   :  { %2430 = vmatprep.subr.bf16.mxu0 %v3858_v45  ;;  %v3811_v45 = vld [vmem:[#allocation3 + $0x648] ss:$16 sps:$4 sm:$0xff]  }
  0xf0   :  { %1945 = vmatpush1.bf16.msra.mxu1 %v3760_v16  ;;  %v3813_v16 = vld [vmem:[#allocation3 + $0x64c] ss:$16 sps:$4 sm:$0xff]  }
  0xf1   :  { %1946 = vmatprep.subr.bf16.mxu1 %v3765_v46  ;;  %v3816_v46 = vld [vmem:[#allocation3 + $0x66c] ss:$16 sps:$4 sm:$0xff]  }
  0xf2   :  { %2431 = vmatpush1.bf16.msra.mxu0 %v3856_v25  ;;  %v3814_v25 = vld [vmem:[#allocation3 + $0x668] ss:$16 sps:$4 sm:$0xff]  }
  0xf3   :  { %2432 = vmatprep.subr.bf16.mxu0 %v3861_v47  ;;  %v3819_v47 = vld [vmem:[#allocation3 + $0x68c] ss:$16 sps:$4 sm:$0xff]  }
  0xf4   :  { %1947 = vmatpush1.bf16.msra.mxu1 %v3763_v48  ;;  %v3817_v48 = vld [vmem:[#allocation3 + $0x688] ss:$16 sps:$4 sm:$0xff]  }
  0xf5   :  { %1948 = vmatprep.subr.bf16.mxu1 %v3768_v50  ;;  %v3822_v50 = vld [vmem:[#allocation3 + $0x6ac] ss:$16 sps:$4 sm:$0xff]  }
  0xf6   :  { %2433 = vmatpush1.bf16.msra.mxu0 %v3859_v18  ;;  %v3825_v18 = vld [vmem:[#allocation3 + $0x6cc] ss:$16 sps:$4 sm:$0xff]  }
  0xf7   :  { %2434 = vmatprep.subr.bf16.mxu0 %v3864_v53 }
  0xf8   :  { %1949 = vmatpush1.bf16.msra.mxu1 %v3766_v3  ;;  %v3897_v3 = vld [vmem:[#allocation6 + $0xe4] ss:$8 sps:$4 sm:$0xff]  }
  0xf9   :  { %1950 = vmatprep.subr.bf16.mxu1 %v3771_v51  ;;  %v3895_v51 = vld [vmem:[#allocation6 + $0xe0] ss:$8 sps:$4 sm:$0xff]  }
  0xfa   :  { %2435 = vmatpush1.bf16.msra.mxu0 %v3862_v52 }
  0xfb   :  { %2436 = vmatprep.subr.bf16.mxu0 %v3867_v54  ;;  %v3823_v54 = vld [vmem:[#allocation3 + $0x6c8] ss:$16 sps:$4 sm:$0xff]  }
  0xfc   :  { %1951 = vmatpush1.bf16.msra.mxu1 %v3769_v55 }
  0xfd   :  { %1952 = vmatprep.subr.bf16.mxu1 %v3774_v56  ;;  %v3828_v56 = vld [vmem:[#allocation3 + $0x6ec] ss:$16 sps:$4 sm:$0xff]  }
  0xfe   :  { %2437 = vmatpush1.bf16.msra.mxu0 %v3865_v57  ;;  %v3900_v57 = vld [vmem:[#allocation6 + $0xf4] ss:$8 sps:$4 sm:$0xff]  }
  0xff   :  { %2438 = vmatprep.subr.bf16.mxu0 %v3870_v58  ;;  %v3898_v58 = vld [vmem:[#allocation6 + $0xf0] ss:$8 sps:$4 sm:$0xff]  }
 0x100   :  { %1953 = vmatpush1.bf16.msra.mxu1 %v3772_v59  ;;  %v3826_v59 = vld [vmem:[#allocation3 + $0x6e8] ss:$16 sps:$4 sm:$0xff]  }
 0x101   :  { %1954 = vmatprep.subr.bf16.mxu1 %v3777_v60  ;;  %v3831_v60 = vld [vmem:[#allocation3 + $0x70c] ss:$16 sps:$4 sm:$0xff]  }
 0x102   :  { %2439 = vmatpush1.bf16.msra.mxu0 %v3868_v61  ;;  %v3903_v61 = vld [vmem:[#allocation6 + $0x104] ss:$8 sps:$4 sm:$0xff]  }
 0x103   :  { %2440 = vmatprep.subr.bf16.mxu0 %v3873_v62  ;;  %v3829_v62 = vld [vmem:[#allocation3 + $0x708] ss:$16 sps:$4 sm:$0xff]  }
 0x104   :  { %1955 = vmatpush1.bf16.msra.mxu1 %v3775_v63  ;;  %v3834_v63 = vld [vmem:[#allocation3 + $0x72c] ss:$16 sps:$4 sm:$0xff]  }
 0x105   :  { %1956 = vmatprep.subr.bf16.mxu1 %v3780_v0  ;;  %v3832_v0 = vld [vmem:[#allocation3 + $0x728] ss:$16 sps:$4 sm:$0xff]  }
 0x106   :  { %2441 = vmatpush1.bf16.msra.mxu0 %v3871_v1  ;;  %v3837_v1 = vld [vmem:[#allocation3 + $0x74c] ss:$16 sps:$4 sm:$0xff]  }
 0x107   :  { %2442 = vmatprep.subr.bf16.mxu0 %v3876_v2  ;;  %v3835_v2 = vld [vmem:[#allocation3 + $0x748] ss:$16 sps:$4 sm:$0xff]  }
 0x108   :  { %1957 = vmatpush1.bf16.msra.mxu1 %v3778_v4  ;;  %v3840_v4 = vld [vmem:[#allocation3 + $0x76c] ss:$16 sps:$4 sm:$0xff]  }
 0x109   :  { %1958 = vmatprep.subr.bf16.mxu1 %v3783_v5  ;;  %v3838_v5 = vld [vmem:[#allocation3 + $0x768] ss:$16 sps:$4 sm:$0xff]  }
 0x10a   :  { %2443 = vmatpush1.bf16.msra.mxu0 %v3874_v6  ;;  %v3843_v6 = vld [vmem:[#allocation3 + $0x78c] ss:$16 sps:$4 sm:$0xff]  }
 0x10b   :  { %2444 = vmatprep.subr.bf16.mxu0 %v3879_v7  ;;  %v3841_v7 = vld [vmem:[#allocation3 + $0x788] ss:$16 sps:$4 sm:$0xff]  }
 0x10c   :  { %1959 = vmatpush1.bf16.msra.mxu1 %v3781_v8  ;;  %v3846_v8 = vld [vmem:[#allocation3 + $0x7ac] ss:$16 sps:$4 sm:$0xff]  }
 0x10d   :  { %1960 = vmatprep.subr.bf16.mxu1 %v3786_v9  ;;  %v3844_v9 = vld [vmem:[#allocation3 + $0x7a8] ss:$16 sps:$4 sm:$0xff]  }
 0x10e   :  { %2445 = vmatpush1.bf16.msra.mxu0 %v3877_v10  ;;  %v3849_v10 = vld [vmem:[#allocation3 + $0x7cc] ss:$16 sps:$4 sm:$0xff]  }
 0x10f   :  { %2446 = vmatprep.subr.bf16.mxu0 %v3882_v11  ;;  %v3847_v11 = vld [vmem:[#allocation3 + $0x7c8] ss:$16 sps:$4 sm:$0xff]  }
 0x110   :  { %1961 = vmatpush1.bf16.msra.mxu1 %v3784_v12  ;;  %v3852_v12 = vld [vmem:[#allocation3 + $0x7ec] ss:$16 sps:$4 sm:$0xff]  }
 0x111   :  { %1962 = vmatprep.subr.bf16.mxu1 %v3789_v13  ;;  %v3850_v13 = vld [vmem:[#allocation3 + $0x7e8] ss:$16 sps:$4 sm:$0xff]  }
 0x112   :  { %2447 = vmatpush1.bf16.msra.mxu0 %v3880_v14  ;;  %v398_v14 = vsub.s32 0, %v4191_v43 }
 0x113   :  { %2448 = vmatprep.subr.bf16.mxu0 %v3885_v15  ;;  %v4255_v15 = vld [vmem:[%s4402_s4] sm:$0xf] }
 0x114   :  { %1963 = vmatpush1.bf16.msra.mxu1 %v3787_v17  ;;  %v402_v17 = vsub.s32 1, %v4191_v43 }
 0x115   :  { %1964 = vmatprep.subr.bf16.mxu1 %v3792_v19  ;;  %v399_v19 = vrot.slane %v4255_v15, %v398_v14 }
 0x116   :  { %2449 = vmatpush1.bf16.msra.mxu0 %v3883_v20  ;;  %v403_v20 = vrot.slane %v4255_v15, %v402_v17 }
 0x117   :  { %2450 = vmatprep.subr.bf16.mxu0 %v3888_v21 }
 0x118   :  { %1965 = vmatpush1.bf16.msra.mxu1 %v3790_v22 }
 0x119   :  { %1966 = vmatprep.subr.bf16.mxu1 %v3795_v23 }
 0x11a   :  { %2451 = vmatpush1.bf16.msra.mxu0 %v3886_v24 }
 0x11b   :  { %2452 = vmatprep.subr.bf16.mxu0 %v3891_v26 }
 0x11c   :  { %1967 = vmatpush1.bf16.msra.mxu1 %v3793_v27 }
 0x11d   :  { %1968 = vmatprep.subr.bf16.mxu1 %v3798_v28 }
 0x11e   :  { %2453 = vmatpush1.bf16.msra.mxu0 %v3889_v29 }
 0x11f   :  { %2454 = vmatprep.subr.bf16.mxu0 %v3894_v30 }
 0x120   :  { %1969 = vmatpush1.bf16.msra.mxu1 %v3796_v32 }
 0x121   :  { %1970 = vmatprep.subr.bf16.mxu1 %v3801_v49  ;;  %v3901_v49 = vld [vmem:[#allocation6 + $0x100] ss:$8 sps:$4 sm:$0xff]  }
 0x122   :  { %2455 = vmatpush1.bf16.msra.mxu0 %v3892_v33 }
 0x123   :  { %2456 = vmatprep.subr.bf16.mxu0 %v3897_v3  ;;  %v3930_v3 = vld [vmem:[#allocation6 + $0x194] ss:$8 sps:$4 sm:$0xff]  }
 0x124   :  { %1971 = vmatpush1.bf16.msra.mxu1 %v3799_v34  ;;  %v3906_v34 = vld [vmem:[#allocation6 + $0x114] ss:$8 sps:$4 sm:$0xff]  }
 0x125   :  { %1972 = vmatprep.subr.bf16.mxu1 %v3804_v36  ;;  %v3904_v36 = vld [vmem:[#allocation6 + $0x110] ss:$8 sps:$4 sm:$0xff]  }
 0x126   :  { %2457 = vmatpush1.bf16.msra.mxu0 %v3895_v51  ;;  %v3933_v51 = vld [vmem:[#allocation6 + $0x1a4] ss:$8 sps:$4 sm:$0xff]  }
 0x127   :  { %2458 = vmatprep.subr.bf16.mxu0 %v3900_v57  ;;  %v3942_v57 = vld [vmem:[#allocation6 + $0x1d4] ss:$8 sps:$4 sm:$0xff]  }
 0x128   :  { %1973 = vmatpush1.bf16.msra.mxu1 %v3802_v37  ;;  %v3909_v37 = vld [vmem:[#allocation6 + $0x124] ss:$8 sps:$4 sm:$0xff]  }
 0x129   :  { %1983 = vmatprep.subr.bf16.mxu1 %v3807_v39  ;;  %v3907_v39 = vld [vmem:[#allocation6 + $0x120] ss:$8 sps:$4 sm:$0xff]  }
 0x12a   :  { %2459 = vmatpush1.bf16.msra.mxu0 %v3898_v58  ;;  %v3940_v58 = vld [vmem:[#allocation6 + $0x1d0] ss:$8 sps:$4 sm:$0xff]  }
 0x12b   :  { %1975 = vmatmul.mubr.bf16.vlgmr.msra.gmra.mrb[4].mxu1 %v4233_v31  ;;  %v3820_v31 = vld [vmem:[#allocation3 + $0x6a8] ss:$16 sps:$4 sm:$0xff]   ;;  %2469 = vmatprep.subr.bf16.mxu0 %v3903_v61  ;;  %v3948_v61 = vld [vmem:[#allocation6 + $0x1f4] ss:$8 sps:$4 sm:$0xff]  }
 0x12c   :  { %1984 = vmatpush1.bf16.msra.mxu1 %v3805_v41  ;;  %2015 = vmatprep.mubr.bf16.mxu1 %v4235_v35  ;;  %v3912_v41 = vld [vmem:[#allocation6 + $0x134] ss:$8 sps:$4 sm:$0xff]  }
 0x12d   :  { %1985 = vmatprep.subr.bf16.mxu1 %v3810_v42  ;;  %v3910_v42 = vld [vmem:[#allocation6 + $0x130] ss:$8 sps:$4 sm:$0xff]  }
 0x130   :  { %1986 = vmatpush1.bf16.msra.mxu1 %v3808_v44  ;;  %v3915_v44 = vld [vmem:[#allocation6 + $0x144] ss:$8 sps:$4 sm:$0xff]  }
 0x131   :  { %1987 = vmatprep.subr.bf16.mxu1 %v3813_v16  ;;  %v3913_v16 = vld [vmem:[#allocation6 + $0x140] ss:$8 sps:$4 sm:$0xff]  }
 0x134   :  { %1988 = vmatpush1.bf16.msra.mxu1 %v3811_v45  ;;  %v3918_v45 = vld [vmem:[#allocation6 + $0x154] ss:$8 sps:$4 sm:$0xff]  }
 0x135   :  { %1989 = vmatprep.subr.bf16.mxu1 %v3816_v46  ;;  %v3916_v46 = vld [vmem:[#allocation6 + $0x150] ss:$8 sps:$4 sm:$0xff]  }
 0x138   :  { %1990 = vmatpush1.bf16.msra.mxu1 %v3814_v25  ;;  %v3921_v25 = vld [vmem:[#allocation6 + $0x164] ss:$8 sps:$4 sm:$0xff]  }
 0x139   :  { %1991 = vmatprep.subr.bf16.mxu1 %v3819_v47  ;;  %v3919_v47 = vld [vmem:[#allocation6 + $0x160] ss:$8 sps:$4 sm:$0xff]  }
 0x13c   :  { %1992 = vmatpush1.bf16.msra.mxu1 %v3817_v48  ;;  %v3924_v48 = vld [vmem:[#allocation6 + $0x174] ss:$8 sps:$4 sm:$0xff]  }
 0x13d   :  { %1993 = vmatprep.subr.bf16.mxu1 %v3822_v50  ;;  %v3922_v50 = vld [vmem:[#allocation6 + $0x170] ss:$8 sps:$4 sm:$0xff]  }
 0x13e   :  { %v1730_v35 = vpop.f32.mrb[0].mxu1 }
 0x13f   :  { %v1732_v53 = vpop.f32.mrb[1].mxu1  ;;  %v1731_v21 = vadd.f32 %v1730_v35, %v399_v19  ;;  %v3928_v35 = vld [vmem:[#allocation6 + $0x190] ss:$8 sps:$4 sm:$0xff]   ;;  %v3950_v19 = vld [vmem:[%s4405_s7] sm:$0xff]  }
 0x140   :  { %v1734_v52 = vpop.f32.mrb[2].mxu1  ;;  %1994 = vmatpush1.bf16.msra.mxu1 %v3820_v31  ;;  %v1733_v22 = vadd.f32 %v1732_v53, %v403_v20  ;;  %v3927_v31 = vld [vmem:[#allocation6 + $0x184] ss:$8 sps:$4 sm:$0xff]   ;;  %v3931_v53 = vld [vmem:[#allocation6 + $0x1a0] ss:$8 sps:$4 sm:$0xff]  }
 0x141   :  { %v1735_v55 = vpop.f32.mrb[3].mxu1  ;;  %1995 = vmatprep.subr.bf16.mxu1 %v3825_v18  ;;  %v3925_v18 = vld [vmem:[#allocation6 + $0x180] ss:$8 sps:$4 sm:$0xff]   ;;  %v3936_v52 = vld [vmem:[#allocation6 + $0x1b4] ss:$8 sps:$4 sm:$0xff]  }
 0x142   :  { %v3939_v55 = vld [vmem:[#allocation6 + $0x1c4] ss:$8 sps:$4 sm:$0xff]  }
 0x144   :  { %1996 = vmatpush1.bf16.msra.mxu1 %v3823_v54  ;;  %v3934_v54 = vld [vmem:[#allocation6 + $0x1b0] ss:$8 sps:$4 sm:$0xff]  }
 0x145   :  { %1997 = vmatprep.subr.bf16.mxu1 %v3828_v56  ;;  %v3937_v56 = vld [vmem:[#allocation6 + $0x1c0] ss:$8 sps:$4 sm:$0xff]  }
 0x148   :  { %1998 = vmatpush1.bf16.msra.mxu1 %v3826_v59  ;;  %v3945_v59 = vld [vmem:[#allocation6 + $0x1e4] ss:$8 sps:$4 sm:$0xff]  }
 0x149   :  { %1999 = vmatprep.subr.bf16.mxu1 %v3831_v60  ;;  %v3943_v60 = vld [vmem:[#allocation6 + $0x1e0] ss:$8 sps:$4 sm:$0xff]  }
 0x14c   :  { %2000 = vmatpush1.bf16.msra.mxu1 %v3829_v62  ;;  %v3946_v62 = vld [vmem:[#allocation6 + $0x1f0] ss:$8 sps:$4 sm:$0xff]  }
 0x14d   :  { %2001 = vmatprep.subr.bf16.mxu1 %v3834_v63  ;;  %v3949_v63 = vld [vmem:[%s4405_s7 + $0x40] sm:$0xff]  }
 0x150   :  { %2002 = vmatpush1.bf16.msra.mxu1 %v3832_v0  ;;  %v406_v0 = vsub.s32 2, %v4191_v43 }
 0x151   :  { %2003 = vmatprep.subr.bf16.mxu1 %v3837_v1  ;;  %v410_v1 = vsub.s32 3, %v4191_v43  ;;  %v2691_v43 = vld [vmem:[%s4407_s9 + $0x8] sm:$0xff] }
 0x154   :  { %2004 = vmatpush1.bf16.msra.mxu1 %v3835_v2  ;;  %v407_v2 = vrot.slane %v4255_v15, %v406_v0 }
 0x155   :  { %2005 = vmatprep.subr.bf16.mxu1 %v3840_v4  ;;  %v411_v4 = vrot.slane %v4255_v15, %v410_v1  ;;  %v3952_v15 = vld [vmem:[%s4405_s7 + $0x8] sm:$0xff]   ;;  %v2858_v1 = vld [vmem:[%s4411_s13] sm:$0xff] }
 0x158   :  { %2006 = vmatpush1.bf16.msra.mxu1 %v3838_v5 }
 0x159   :  { %2007 = vmatprep.subr.bf16.mxu1 %v3843_v6 }
 0x15c   :  { %2008 = vmatpush1.bf16.msra.mxu1 %v3841_v7 }
 0x15d   :  { %2009 = vmatprep.subr.bf16.mxu1 %v3846_v8 }
 0x160   :  { %2010 = vmatpush1.bf16.msra.mxu1 %v3844_v9 }
 0x161   :  { %2011 = vmatprep.subr.bf16.mxu1 %v3849_v10 }
 0x164   :  { %2012 = vmatpush1.bf16.msra.mxu1 %v3847_v11 }
 0x165   :  { %2013 = vmatprep.subr.bf16.mxu1 %v3852_v12 }
 0x168   :  { %2014 = vmatpush1.bf16.msra.mxu1 %v3850_v13 }
 0x16b   :  { %2016 = vmatmul.mubr.bf16.vlgmr.msra.gmra.mrb[4].mxu1 %v4243_v40 }
 0x1bf   :  { %v1853_v40 = vpop.f32.mrb[0].mxu0 }
 0x1c0   :  { %v3424_v23 = vadd.f32 %v1853_v40, %v1731_v21  ;;  %v1855_v24 = vpop.f32.mrb[1].mxu0  ;;  %v3951_v21 = vld [vmem:[%s4405_s7 + $0x48] sm:$0xff]   ;;  %v3954_v40 = vld [vmem:[%s4405_s7 + $0x10] sm:$0xff]  }
 0x1c1   :  { %v3426_v26 = vadd.f32 %v1855_v24, %v1733_v22  ;;  %v1857_v27 = vpop.f32.mrb[2].mxu0  ;;  %v3953_v22 = vld [vmem:[%s4405_s7 + $0x50] sm:$0xff]   ;;  %v3956_v24 = vld [vmem:[%s4405_s7 + $0x18] sm:$0xff]  }
 0x1c2   :  { %v2024_v28 = vmax.f32 %v3424_v23, 0.0  ;;  %v1858_v29 = vpop.f32.mrb[3].mxu0  ;;  %v3955_v23 = vld [vmem:[%s4405_s7 + $0x58] sm:$0xff]   ;;  %v3958_v27 = vld [vmem:[%s4405_s7 + $0x20] sm:$0xff]  }
 0x1c3   :  { %v2025_v30 = vmax.f32 %v3426_v26, 0.0  ;;  %v3957_v26 = vld [vmem:[%s4405_s7 + $0x60] sm:$0xff]   ;;  %v3960_v29 = vld [vmem:[%s4405_s7 + $0x28] sm:$0xff]  }
 0x1c4   :  { %v2028_v33 = vpack.c.bf16 %v2024_v28, %v2024_v28  ;;  %v3959_v28 = vld [vmem:[%s4405_s7 + $0x68] sm:$0xff]  }
 0x1c5   :  { %v2029_v32 = vpack.c.bf16 %v2025_v30, %v2025_v30  ;;  %v3961_v30 = vld [vmem:[%s4405_s7 + $0x70] sm:$0xff]  }
 0x1c7   :  { %2460 = vmatprep.mubr.bf16.mxu0 %v2029_v32  ;;  %v3962_v32 = vld [vmem:[%s4405_s7 + $0x30] sm:$0xff]  }
 0x1c8   :  { %2461 = vmatmul.mubr.bf16.vlgmr.msra.gmra.mrb[4].mxu0 %v2028_v33  ;;  %v3964_v33 = vld [vmem:[%s4405_s7 + $0x38] sm:$0xff]  }
 0x1c9   :  { %2470 = vmatpush1.bf16.msra.mxu0 %v3901_v49  ;;  %v3963_v49 = vld [vmem:[%s4405_s7 + $0x78] sm:$0xff]  }
 0x1ca   :  { %2471 = vmatprep.subr.bf16.mxu0 %v3906_v34  ;;  %v4076_v34 = vmov 0.0|0.0  }
 0x1cb   :  { %3417 = vmatprep.subr.bf16.mxu1 %v4076_v34 }
 0x1cd   :  { %2472 = vmatpush1.bf16.msra.mxu0 %v3904_v36  ;;  %v2096_v36 = vld [vmem:[%s4404_s6] sm:$0x3] }
 0x1ce   :  { %2473 = vmatprep.subr.bf16.mxu0 %v3909_v37  ;;  %v2101_v37 = vrot.slane %v2096_v36, %v398_v14 }
 0x1d1   :  { %2474 = vmatpush1.bf16.msra.mxu0 %v3907_v39  ;;  %v2105_v39 = vrot.slane %v2096_v36, %v402_v17  ;;  %v4077_v17 = vmov 0.0  }
 0x1d2   :  { %2475 = vmatprep.subr.bf16.mxu0 %v3912_v41  ;;  %3402 = vmatprep.mubr.msk.f32.mxu1 %vm4078_vm0, %v4077_v17 }
 0x1d5   :  { %2476 = vmatpush1.bf16.msra.mxu0 %v3910_v42 }
 0x1d6   :  { %2477 = vmatprep.subr.bf16.mxu0 %v3915_v44 }
 0x1d9   :  { %2478 = vmatpush1.bf16.msra.mxu0 %v3913_v16 }
 0x1da   :  { %2479 = vmatprep.subr.bf16.mxu0 %v3918_v45 }
 0x1dd   :  { %2480 = vmatpush1.bf16.msra.mxu0 %v3916_v46 }
 0x1de   :  { %2481 = vmatprep.subr.bf16.mxu0 %v3921_v25 }
 0x1e1   :  { %2482 = vmatpush1.bf16.msra.mxu0 %v3919_v47 }
 0x1e2   :  { %2483 = vmatprep.subr.bf16.mxu0 %v3924_v48 }
 0x1e5   :  { %2484 = vmatpush1.bf16.msra.mxu0 %v3922_v50 }
 0x1e6   :  { %2485 = vmatprep.subr.bf16.mxu0 %v3927_v31  ;;  %v2690_v31 = vld [vmem:[%s4407_s9] sm:$0xff] }
 0x1e7   :  { %v3418_v14 = vpack.c.bf16 %v2691_v43, %v2690_v31 }
 0x1e9   :  { %2486 = vmatpush1.bf16.msra.mxu0 %v3925_v18  ;;  %3419 = vmatpush3.bf16.msra.mxu1 %v3418_v14  ;;  %v2692_v18 = vld [vmem:[%s4407_s9 + $0x10] sm:$0xff] }
 0x1ea   :  { %2487 = vmatprep.subr.bf16.mxu0 %v3930_v3  ;;  %3400 = vmatprep.subr.mxu1 %v4077_v17 }
 0x1ed   :  { %2488 = vmatpush1.bf16.msra.mxu0 %v3928_v35  ;;  %3401 = vmatpush3.msra.mxu1 %v2692_v18  ;;  %v3341_v35 = vld [vmem:[%s4406_s8] ss:$0 sm:$0xff] }
 0x1ee   :  { %2489 = vmatprep.subr.bf16.mxu0 %v3933_v51  ;;  %3420 = vmatprep.subr.bf16.mxu1 %v4076_v34 }
 0x1f1   :  { %2490 = vmatpush1.bf16.msra.mxu0 %v3931_v53 }
 0x1f2   :  { %2491 = vmatprep.subr.bf16.mxu0 %v3936_v52 }
 0x1f5   :  { %2492 = vmatpush1.bf16.msra.mxu0 %v3934_v54 }
 0x1f6   :  { %2493 = vmatprep.subr.bf16.mxu0 %v3939_v55 }
 0x1f9   :  { %2494 = vmatpush1.bf16.msra.mxu0 %v3937_v56 }
 0x1fa   :  { %2495 = vmatprep.subr.bf16.mxu0 %v3942_v57  ;;  %v2775_v57 = vld [vmem:[%s4409_s11] sm:$0xff] }
 0x1fd   :  { %2496 = vmatpush1.bf16.msra.mxu0 %v3940_v58  ;;  %v2776_v58 = vld [vmem:[%s4409_s11 + $0x8] sm:$0xff] }
 0x1fe   :  { %2497 = vmatprep.subr.bf16.mxu0 %v3945_v59  ;;  %v3421_v59 = vpack.c.bf16 %v2776_v58, %v2775_v57 }
 0x201   :  { %2498 = vmatpush1.bf16.msra.mxu0 %v3943_v60  ;;  %v3358_v60 = vld [vmem:[%s4408_s10] ss:$0 sm:$0xff] }
 0x202   :  { %2499 = vmatprep.subr.bf16.mxu0 %v3948_v61 }
 0x205   :  { %2500 = vmatpush1.bf16.msra.mxu0 %v3946_v62 }
 0x206   :  { %3365 = vmatprep.subr.bf16.mxu0 %v3949_v63 }
 0x23e   :  { %v2017_v5 = vpop.f32.mrb[4].mxu1 }
 0x23f   :  { %v3427_v6 = vadd.f32 %v2017_v5, %v407_v2  ;;  %v2019_v7 = vpop.f32.mrb[5].mxu1  ;;  %v3360_v2 = vld [vmem:[%s4410_s12] ss:$0 sm:$0xff] }
 0x240   :  { %v3428_v8 = vadd.f32 %v2019_v7, %v411_v4  ;;  %v2021_v9 = vpop.f32.mrb[6].mxu1  ;;  %v2943_v7 = vld [vmem:[%s4400_s2] sm:$0x3] }
 0x241   :  { %v2026_v10 = vmax.f32 %v3427_v6, 0.0  ;;  %v2022_v11 = vpop.f32.mrb[7].mxu1 }
 0x242   :  { %v2027_v12 = vmax.f32 %v3428_v8, 0.0  ;;  %v2944_v8 = vadd.f32 1e-20, %v2943_v7 }
 0x243   :  { %v2030_v20 = vpack.c.bf16 %v2026_v10, %v2026_v10 }
 0x244   :  { %v2031_v13 = vpack.c.bf16 %v2027_v12, %v2027_v12  ;;  %3965 = vlog2.f32 %v2944_v8 }
 0x246   :  { %2501 = vmatprep.mubr.bf16.mxu0 %v2031_v13 }
 0x247   :  { %2502 = vmatmul.mubr.bf16.vlgmr.msra.gmra.mrb[4].mxu0 %v2030_v20  ;;  %v3362_v20 = vld [vmem:[%s4412_s14] ss:$0 sm:$0xff]  ;;  %s4079_s14 = smov [#allocation9]  }
 0x248   :  { %3366 = vmatpush3.bf16.msra.mxu0 %v3950_v19  ;;  %s3007_s17 = sshll.u32 %s4079_s14, 4  ;;  %s3008_s17 = int_to_ptr.vmem [resolvable:$true] %s3007_s17 }
 0x249   :  { %3367 = vmatprep.subr.bf16.mxu0 %v3951_v21  ;;  %s4017_s5 = scalar_lea.vmem %s3008_s17, 32  ;;  %p4022_p3 = scmp.lt.s32.totalorder %s3008_s17, %s3008_s17 }
 0x24a   :  { %p4018_p2 = scmp.ne.s32.totalorder %s3008_s17, %s4017_s5  ;;  %p4023_p4 = scmp.lt.s32.totalorder %s4017_s5, %s4017_s5 }
 0x24c   :  { %3368 = vmatpush3.bf16.msra.mxu0 %v3952_v15  ;;  %p4024_p5 = por %p4023_p4, %p4022_p3 }
 0x24d   :  { %3369 = vmatprep.subr.bf16.mxu0 %v3953_v22 }
 0x24e   :  { %v3966_v9 = vpop.eup %3965  ;;  %p4025_p6 = pnand %p4024_p5, %p4018_p2 }
 0x24f   :  { %v2946_v10 = vmul.f32 0.6931472, %v3966_v9 }
 0x250   :  { %3370 = vmatpush3.bf16.msra.mxu0 %v3954_v40 }
 0x251   :  { %3371 = vmatprep.subr.bf16.mxu0 %v3955_v23  ;;  %v2947_v11 = vsub.f32 0.0, %v2946_v10  ;;  %v2953_v23 = vstv %s4416_s0 }
 0x253   :  { %v2948_v12 = vadd.f32 1e-20, %v2947_v11 }
 0x254   :  { %3372 = vmatpush3.bf16.msra.mxu0 %v3956_v24 }
 0x255   :  { %3373 = vmatprep.subr.bf16.mxu0 %v3957_v26  ;;  %3967 = vlog2.f32 %v2948_v12 }
 0x258   :  { %3374 = vmatpush3.bf16.msra.mxu0 %v3958_v27 }
 0x259   :  { %3375 = vmatprep.subr.bf16.mxu0 %v3959_v28  ;;  %v2967_v28 = vand.u32 127, %v92_v38 }
 0x25c   :  { %3376 = vmatpush3.bf16.msra.mxu0 %v3960_v29 }
 0x25d   :  { %3377 = vmatprep.subr.bf16.mxu0 %v3961_v30 }
 0x25f   :  { %v3968_v13 = vpop.eup %3967 }
 0x260   :  { %3378 = vmatpush3.bf16.msra.mxu0 %v3962_v32  ;;  %v2950_v19 = vmul.f32 0.6931472, %v3968_v13 }
 0x261   :  { %3379 = vmatprep.subr.bf16.mxu0 %v3963_v49 }
 0x262   :  { %v2951_v21 = vsub.f32 0.0, %v2950_v19 }
 0x264   :  { %3380 = vmatpush3.bf16.msra.mxu0 %v3964_v33 }
 0x31a   :  { %v2503_v41 = vpop.f32.mrb[4].mxu0 }
 0x31b   :  { %v3429_v42 = vadd.f32 %v2503_v41, %v2101_v37  ;;  %v2505_v44 = vpop.f32.mrb[5].mxu0 }
 0x31c   :  { %v3430_v16 = vadd.f32 %v2505_v44, %v2105_v39  ;;  %v2507_v45 = vpop.f32.mrb[6].mxu0 }
 0x31d   :  { %v2510_v46 = vmax.f32 %v3429_v42, 0.0  ;;  %v2508_v25 = vpop.f32.mrb[7].mxu0 }
 0x31e   :  { %v2511_v47 = vmax.f32 %v3430_v16, 0.0 }
 0x31f   :  { %v2512_v50 = vpack.c.bf16 %v2510_v46, %v2510_v46 }
 0x320   :  { %v2513_v48 = vpack.c.bf16 %v2511_v47, %v2511_v47 }
 0x322   :  { %2681 = vmatprep.mubr.bf16.mxu0 %v2513_v48 }
 0x323   :  { %2682 = vmatmul.mubr.bf16.vlgmr.msra.gmra.mrb[8].mxu0 %v2512_v50 }
 0x3f6   :  { %v3381_v3 = vpop.f32.mrb[8].mxu0 }
 0x3f7   :  { %v3382_v51 = vpop.f32.mrb[9].mxu0 }
 0x3f8   :  { %v3383_v53 = vadd.f32 %v3382_v51, %v3381_v3  ;;  %v3384_v52 = vpop.f32.mrb[10].mxu0 }
 0x3f9   :  { %v3385_v54 = vpop.f32.mrb[11].mxu0 }
 0x3fa   :  { %v2684_v55 = vadd.f32 %v3383_v53, %v3341_v35 }
 0x3fc   :  { %v2689_v56 = vmax.f32 %v2684_v55, 0.0 }
 0x3fe   :  { %3403 = vmatmul.mubr.msk.f32.vlgmr.msra.gmra.mrb[8].mxu1 %vm2700_vm1, %v2689_v56 }
 0x3ff   :  { %3409 = vmatprep.mubr.msk.f32.mxu1 %vm4078_vm0, %v4077_v17  ;;  %3422 = vmatpush3.bf16.msra.mxu1 %v3421_v59 }
 0x400   :  { %3412 = vmatprep.subr.mxu1 %v4077_v17 }
 0x4d1   :  { %v2770_v61 = vpop.f32.mrb[8].mxu1 }
 0x4d2   :  { %v2771_v62 = vadd.f32 %v3358_v60, %v2770_v61  ;;  %v3404_v63 = vpop.f32.mrb[9].mxu1 }
 0x4d4   :  { %v2774_v0 = vmax.f32 %v2771_v62, 0.0 }
 0x4d6   :  { %3410 = vmatmul.mubr.msk.f32.vlgmr.msra.gmra.mrb[10].mxu1 %vm2784_vm2, %v2774_v0 }
 0x4d7   :  { %3413 = vmatpush3.msra.mxu1 %v2858_v1  ;;  %3414 = vmatprep.mubr.msk.f32.mxu1 %vm4078_vm0, %v4077_v17 }
 0x5a9   :  { %v2854_v4 = vpop.f32.mrb[10].mxu1 }
 0x5aa   :  { %v2855_v5 = vadd.f32 %v3360_v2, %v2854_v4  ;;  %v3411_v6 = vpop.f32.mrb[11].mxu1 }
 0x5ac   :  { %3415 = vmatmul.mubr.msk.f32.vlgmr.msra.gmra.mrb[12].mxu1 %vm2866_vm3, %v2855_v5 }
 0x67f   :  { %v2936_v15 = vpop.f32.mrb[12].mxu1 }
 0x680   :  { %v2937_v22 = vadd.f32 %v3362_v20, %v2936_v15  ;;  %v3416_v40 = vpop.f32.mrb[13].mxu1 }
 0x682   :  { %v2952_v24 = vadd.f32 %v2951_v21, %v2937_v22  ;;  %2941 = vst.msk [vmem:[#allocation9] sm:$0x3] %vm2940_vm4, %v2937_v22 }
 0x684   :  { %v2954_v26 = vmul.f32 %v2953_v23, %v2952_v24 }
 0x686   :  { %v2955_v27 = vsel %vm2940_vm4, %v2954_v26, -inf }
 0x687   :  { %2956 = vmax.xlane.f32.xlu0 %v2955_v27 }
 0x714   :  { %v2957_v29 = vpop.xlane.xlu0 %2956 }
 0x715   :  { %v2958_v30 = vsub.f32 %v2954_v26, %v2957_v29  ;;  %vm2968_vm5 = vcmp.ge.f32.partialorder %v2954_v26, %v2957_v29 }
 0x716   :  { %v2969_v32 = vsel %vm2968_vm5, %v2967_v28, 16 }
 0x717   :  { %v2959_v49 = vmul.f32 1.442695, %v2958_v30  ;;  %v2970_v33 = vsel %vm2940_vm4, %v2969_v32, 2147483647 }
 0x718   :  { %v2972_v34 = vshra.s32 %v2970_v33, 16  ;;  %v2971_v41 = vand.u32 65535, %v2970_v33 }
 0x719   :  { %3969 = vpow2.f32 %v2959_v49 }
 0x71a   :  { %v2974_v36 = vcvt.s32.f32 %v2972_v34  ;;  %v2973_v44 = vcvt.s32.f32 %v2971_v41 }
 0x71c   :  { %2975 = vmin.xlane.f32.xlu0 %v2974_v36 }
 0x723   :  { %v3970_v37 = vpop.eup %3969 }
 0x724   :  { %v2961_v39 = vsel %vm2940_vm4, %v3970_v37, 0.0 }
 0x725   :  { %2962 = vadd.xlane.f32.xlu1 %v2961_v39 }
 0x7a9   :  { %v2976_v42 = vpop.xlane.xlu0 %2975 }
 0x7aa   :  { %vm2977_vm6 = vcmp.eq.f32.partialorder %v2974_v36, %v2976_v42 }
 0x7ab   :  { %v2978_v38 = vsel %vm2977_vm6, %v2973_v44, inf }
 0x7ac   :  { %2979 = vmin.xlane.f32.xlu1 %v2978_v38 }
 0x7ad   :  { %4028 = shalt.err (!%p4025_p6)
}
 0x7ae   :  { %s4029_s6 = scalar_lea.hbm %s4414_s16, 32 }
 0x7af   :  { %p4030_p7 = scmp.ne.s32.totalorder %s4414_s16, %s4029_s6  ;;  %p4033_p8 = scmp.lt.u32.totalorder %s4029_s6, %s4414_s16 }
 0x7b1   :  { %p4035_p9 = pnand %p4033_p8, %p4030_p7 }
 0x7b3   :  { %4038 = shalt.err (!%p4035_p9)
}
 0x7b4   :  { %3010 = dma.vmem_to_hbm [thread:$0]  %s3008_s17, 32, %s4414_s16, [#allocation10]   ;;  %v2963_v16 = vpop.xlane.xlu1 %2962  ;;  %v2982_v45 = vcvt.f32.s32 %v2976_v42 }
 0x7b5   :  { %3971 = vrcp.f32 %v2963_v16  ;;  %s4080_s9 = smov [#allocation8]  }
 0x7b6   :  { %v2983_v25 = vshll.u32 %v2982_v45, 16  ;;  %s2997_s24 = sshll.u32 %s4080_s9, 4  ;;  %s2998_s24 = int_to_ptr.vmem [resolvable:$true] %s2997_s24 }
 0x7b7   :  { %s4039_s16 = scalar_lea.vmem %s2998_s24, 32  ;;  %p4044_p11 = scmp.lt.s32.totalorder %s2998_s24, %s2998_s24 }
 0x7b8   :  { %p4040_p10 = scmp.ne.s32.totalorder %s2998_s24, %s4039_s16  ;;  %p4045_p12 = scmp.lt.s32.totalorder %s4039_s16, %s4039_s16 }
 0x7ba   :  { %p4046_p13 = por %p4045_p12, %p4044_p11 }
 0x7bc   :  { %p4047_p0 = pnand %p4046_p13, %p4040_p10 }
 0x7bf   :  { %v3972_v48 = vpop.eup %3971 }
 0x7c0   :  { %v2965_v31 = vmul.f32 %v3972_v48, %v3970_v37 }
 0x839   :  { %v2980_v46 = vpop.xlane.xlu1 %2979 }
 0x83a   :  { %v2981_v47 = vcvt.f32.s32 %v2980_v46 }
 0x83c   :  { %v2984_v50 = vadd.s32 %v2983_v25, %v2981_v47 }
 0x83e   :  { %vm2985_vm7 = vcmp.eq.s32.totalorder %v2967_v28, %v2984_v50 }
 0x83f   :  { %v3364_v43 = vsel %vm2985_vm7, 1.0, %v4077_v17 }
 0x840   :  { %v2988_v14 = vsub.f32 %v3364_v43, %v2965_v31 }
 0x842   :  { %v2989_v18 = vadd.f32 %v2988_v14, %v2965_v31 }
 0x844   :  { %2990 = vst.msk [vmem:[#allocation8] sm:$0x3] %vm2940_vm4, %v2989_v18 }
 0x845   :  { %4050 = shalt.err (!%p4047_p0)
}
 0x846   :  { %s4051_s8 = scalar_lea.hbm %s4413_s15, 32 }
 0x847   :  { %p4052_p1 = scmp.ne.s32.totalorder %s4413_s15, %s4051_s8  ;;  %p4055_p2 = scmp.lt.u32.totalorder %s4051_s8, %s4413_s15 }
 0x849   :  { %p4057_p3 = pnand %p4055_p2, %p4052_p1 }
 0x84b   :  { %4060 = shalt.err (!%p4057_p3)
}
 0x84c   :  { %3000 = dma.vmem_to_hbm [thread:$0]  %s2998_s24, 32, %s4413_s15, [#allocation5]  }
 0x84d   :  { %4065 = dma.done.wait [#allocation5], 32  }
 0x84e   :  { %4066 = vsyncadd [#allocation5], 4294967264 }
 0x84f   :  { %4067 = dma.done.wait [#allocation10], 32  }
 0x850   :  { %4068 = vsyncadd [#allocation10], 4294967264 }
 0x851   :  { %3017 = vsyncpa [#allocation4], 1 }
 0x852   :  { %3018 = vsyncpa [#allocation7], 1 }
 0x853   :  { %3019 = vsyncpa [#allocation5], 1 }
 0x854   :  { %3020 = vsyncpa [#allocation10], 1 }

</bundles_post_ra>
